<compile_context>
chip_gen: v5e
topology: v5e:2x2
jax: 0.10.0
libtpu: 0.0.40
codegen_flags: <defaults>
</compile_context>

<pallas_src>
import jax
import jax.numpy as jnp
from jax.experimental import pallas as pl
from jax.experimental.pallas import tpu as pltpu


# ---------------------------------------------------------------------------
# Fused forward kernel (embedding gather + stacked LSTM layers + fc1)
# ---------------------------------------------------------------------------
def _make_fused_kernel(num_layers, b_real, b_pad, seq_len, emb_dim, hidden_dim):
    H = hidden_dim
    E = emb_dim
    T = seq_len

    def kernel(ids_ref, emb_ref, *refs):
        # refs layout: w_0, b_0, ..., w_{L-1}, b_{L-1}, fc_w, fc_b, out_ref
        layer_refs = refs[: 2 * num_layers]
        fcw_ref, fcb_ref, out_ref = refs[2 * num_layers:]

        # Hoist weight loads out of the unrolled time loop.
        ws = [layer_refs[2 * l][...] for l in range(num_layers)]
        bs = [layer_refs[2 * l + 1][...] for l in range(num_layers)]

        # Zero block for batch padding (hoisted: constant, built once).
        pad_rows = None
        if b_pad > b_real:
            pad_rows = jnp.zeros((b_pad - b_real, E), jnp.float32)

        def cell(xh_cat, c_prev, w, b):
            # One MXU matmul per timestep/layer: [x_t, h_prev] @ [W_ih; W_hh] + bias.
            gates = jnp.dot(xh_cat, w, preferred_element_type=jnp.float32) + b
            # Full 128-lane-width EUP ops (one sigmoid, one tanh over all gates),
            # then static H-wide lane slices for the combine.
            sg = jax.nn.sigmoid(gates)
            tg = jnp.tanh(gates)
            i_g = sg[:, 0 * H:1 * H]
            f_g = sg[:, 1 * H:2 * H]
            g_g = tg[:, 2 * H:3 * H]
            o_g = sg[:, 3 * H:4 * H]
            c_new = f_g * c_prev + i_g * g_g
            h_new = o_g * jnp.tanh(c_new)
            return h_new, c_new

        # Recurrent state carried in registers (no scratch, no HBM traffic).
        h = [jnp.zeros((b_pad, H), jnp.float32) for _ in range(num_layers)]
        c = [jnp.zeros((b_pad, H), jnp.float32) for _ in range(num_layers)]

        for t in range(T):  # fully unrolled: T is small and static
            # Embedding gather for timestep t: scalar token ids from SMEM index the
            # VMEM-resident table along its (non-tiled) leading dim.
            rows = [emb_ref[ids_ref[b, t]] for b in range(b_real)]
            x_t = jnp.concatenate(rows, axis=0).reshape(b_real, E)
            if pad_rows is not None:
                x_t = jnp.concatenate([x_t, pad_rows], axis=0)

            inp = x_t
            for l in range(num_layers):
                h[l], c[l] = cell(
                    jnp.concatenate([inp, h[l]], axis=1), c[l], ws[l], bs[l])
                inp = h[l]

        # fc1 on the last timestep of the last layer only.
        out_ref[...] = (
            jnp.dot(h[num_layers - 1], fcw_ref[...],
                    preferred_element_type=jnp.float32)
            + fcb_ref[...]
        )

    return kernel


# ---------------------------------------------------------------------------
# Parameter initialization (mirrors PyTorch module shapes / distributions)
# ---------------------------------------------------------------------------
def init_params(key, vocab_size, embedding_dim, hidden_dim, layer_dim, output_dim):
    params = {}
    k_emb, key = jax.random.split(key)
    # nn.Embedding default init: N(0, 1)
    params["embedding"] = jax.random.normal(
        k_emb, (vocab_size, embedding_dim), dtype=jnp.float32)

    bound = 1.0 / jnp.sqrt(hidden_dim)
    lstm_layers = []
    for layer in range(layer_dim):
        in_dim = embedding_dim if layer == 0 else hidden_dim
        k1, k2, k3, k4, key = jax.random.split(key, 5)
        # Stored transposed for right-multiplication and pre-stacked [W_ih; W_hh]
        # -> (in_dim + H, 4H) so each timestep is a single matmul.
        w_ih = jax.random.uniform(k1, (in_dim, 4 * hidden_dim),
                                  minval=-bound, maxval=bound, dtype=jnp.float32)
        w_hh = jax.random.uniform(k2, (hidden_dim, 4 * hidden_dim),
                                  minval=-bound, maxval=bound, dtype=jnp.float32)
        b_ih = jax.random.uniform(k3, (4 * hidden_dim,),
                                  minval=-bound, maxval=bound, dtype=jnp.float32)
        b_hh = jax.random.uniform(k4, (4 * hidden_dim,),
                                  minval=-bound, maxval=bound, dtype=jnp.float32)
        lstm_layers.append({
            "w": jnp.concatenate([w_ih, w_hh], axis=0),      # (in + H, 4H)
            "b": (b_ih + b_hh).reshape(1, -1),                # (1, 4H)
        })
    params["lstm"] = lstm_layers

    k_w, k_b, key = jax.random.split(key, 3)
    fc_bound = 1.0 / jnp.sqrt(hidden_dim)
    params["fc1_w"] = jax.random.uniform(
        k_w, (hidden_dim, output_dim), minval=-fc_bound, maxval=fc_bound,
        dtype=jnp.float32)
    params["fc1_b"] = jax.random.uniform(
        k_b, (1, output_dim), minval=-fc_bound, maxval=fc_bound,
        dtype=jnp.float32)
    return params


# ---------------------------------------------------------------------------
# Forward pass (matches LSTMNet.forward), single fused pallas_call
# ---------------------------------------------------------------------------
@jax.jit
def lstm_net_forward(params, x_tokens):
    emb = params["embedding"]                      # (V, E)
    V, E = emb.shape
    B, T = x_tokens.shape
    lstm_layers = params["lstm"]
    num_layers = len(lstm_layers)
    H = lstm_layers[0]["w"].shape[1] // 4
    O = params["fc1_w"].shape[1]

    # Pad batch to the f32 sublane tile (8) so vregs / MXU M-dim stay dense.
    B_pad = max(8, ((B + 7) // 8) * 8)

    kernel = _make_fused_kernel(num_layers, B, B_pad, T, E, H)

    # (V, 1, E): dynamic gather indexes the non-tiled leading dim inside the kernel.
    emb3 = emb.reshape(V, 1, E)

    weight_inputs = []
    in_specs = [pl.BlockSpec((V, 1, E), lambda i, ids: (0, 0, 0))]
    for lp in lstm_layers:
        weight_inputs += [lp["w"], lp["b"]]
        in_specs += [
            pl.BlockSpec(lp["w"].shape, lambda i, ids: (0, 0)),
            pl.BlockSpec(lp["b"].shape, lambda i, ids: (0, 0)),
        ]
    weight_inputs += [params["fc1_w"], params["fc1_b"]]
    in_specs += [
        pl.BlockSpec(params["fc1_w"].shape, lambda i, ids: (0, 0)),
        pl.BlockSpec(params["fc1_b"].shape, lambda i, ids: (0, 0)),
    ]

    out = pl.pallas_call(
        kernel,
        out_shape=jax.ShapeDtypeStruct((B_pad, O), jnp.float32),
        grid_spec=pltpu.PrefetchScalarGridSpec(
            num_scalar_prefetch=1,            # token ids -> SMEM
            grid=(1,),                        # single invocation; recurrence unrolled inside
            in_specs=in_specs,
            out_specs=pl.BlockSpec((B_pad, O), lambda i, ids: (0, 0)),
        ),
        compiler_params=pltpu.CompilerParams(
            dimension_semantics=("arbitrary",)),
    )(x_tokens.astype(jnp.int32), emb3, *weight_inputs)

    return out[:B]


if __name__ == "__main__":
    vocab_size = 50
    embedding_dim = 16
    hidden_dim = 32
    layer_dim = 2
    output_dim = 4
    batch = 2
    seq_len = 8

    key = jax.random.PRNGKey(0)
    k_params, k_x = jax.random.split(key)
    params = init_params(k_params, vocab_size, embedding_dim, hidden_dim,
                         layer_dim, output_dim)
    x_tokens = jax.random.randint(k_x, (batch, seq_len), 0, vocab_size,
                                  dtype=jnp.int32)

    out = lstm_net_forward(params, x_tokens)
    jax.block_until_ready(out)
    assert out.shape == (batch, output_dim)
    print("KERNEL_OK")
</pallas_src>

<mosaic_0001>
module attributes {stable_mosaic.version = 11 : i64} {
  func.func @kernel(%arg0: i32, %arg1: memref<2x8xi32, #tpu.memory_space<smem>>, %arg2: memref<50x1x16xf32, #tpu.memory_space<vmem>>, %arg3: memref<48x128xf32, #tpu.memory_space<vmem>>, %arg4: memref<1x128xf32, #tpu.memory_space<vmem>>, %arg5: memref<64x128xf32, #tpu.memory_space<vmem>>, %arg6: memref<1x128xf32, #tpu.memory_space<vmem>>, %arg7: memref<32x4xf32, #tpu.memory_space<vmem>>, %arg8: memref<1x4xf32, #tpu.memory_space<vmem>>, %arg9: memref<8x4xf32, #tpu.memory_space<vmem>>) attributes {dimension_semantics = [#tpu.dimension_semantics<arbitrary>], iteration_bounds = array<i64: 1>, scalar_prefetch = 1 : i64, scratch_operands = 0 : i64, tpu.core_type = #tpu.core_type<tc>, window_params = [{pipeline_mode = #tpu.pipeline_mode<synchronous>, transform_indices = @transform_0, window_bounds = array<i64: 50, 1, 16>}, {pipeline_mode = #tpu.pipeline_mode<synchronous>, transform_indices = @transform_1, window_bounds = array<i64: 48, 128>}, {pipeline_mode = #tpu.pipeline_mode<synchronous>, transform_indices = @transform_2, window_bounds = array<i64: 1, 128>}, {pipeline_mode = #tpu.pipeline_mode<synchronous>, transform_indices = @transform_3, window_bounds = array<i64: 64, 128>}, {pipeline_mode = #tpu.pipeline_mode<synchronous>, transform_indices = @transform_4, window_bounds = array<i64: 1, 128>}, {pipeline_mode = #tpu.pipeline_mode<synchronous>, transform_indices = @transform_5, window_bounds = array<i64: 32, 4>}, {pipeline_mode = #tpu.pipeline_mode<synchronous>, transform_indices = @transform_6, window_bounds = array<i64: 1, 4>}, {pipeline_mode = #tpu.pipeline_mode<synchronous>, transform_indices = @transform_7, window_bounds = array<i64: 8, 4>}]} {
    %c0 = arith.constant 0 : index
    %c0_0 = arith.constant 0 : index
    %0 = vector.load %arg3[%c0, %c0_0] : memref<48x128xf32, #tpu.memory_space<vmem>>, vector<48x128xf32>
    %c0_1 = arith.constant 0 : index
    %c0_2 = arith.constant 0 : index
    %1 = vector.load %arg5[%c0_1, %c0_2] : memref<64x128xf32, #tpu.memory_space<vmem>>, vector<64x128xf32>
    %c0_3 = arith.constant 0 : index
    %c0_4 = arith.constant 0 : index
    %2 = vector.load %arg4[%c0_3, %c0_4] : memref<1x128xf32, #tpu.memory_space<vmem>>, vector<1x128xf32>
    %c0_5 = arith.constant 0 : index
    %c0_6 = arith.constant 0 : index
    %3 = vector.load %arg6[%c0_5, %c0_6] : memref<1x128xf32, #tpu.memory_space<vmem>>, vector<1x128xf32>
    %cst = arith.constant 0.000000e+00 : f32
    %4 = vector.broadcast %cst : f32 to vector<6x16xf32>
    %cst_7 = arith.constant 0.000000e+00 : f32
    %5 = vector.broadcast %cst_7 : f32 to vector<8x32xf32>
    %cst_8 = arith.constant 0.000000e+00 : f32
    %6 = vector.broadcast %cst_8 : f32 to vector<8x32xf32>
    %cst_9 = arith.constant 0.000000e+00 : f32
    %7 = vector.broadcast %cst_9 : f32 to vector<8x32xf32>
    %cst_10 = arith.constant 0.000000e+00 : f32
    %8 = vector.broadcast %cst_10 : f32 to vector<8x32xf32>
    %c0_11 = arith.constant 0 : index
    %c0_12 = arith.constant 0 : index
    %9 = memref.load %arg1[%c0_11, %c0_12] : memref<2x8xi32, #tpu.memory_space<smem>>
    %10 = arith.index_cast %9 : i32 to index
    %c0_13 = arith.constant 0 : index
    %c0_14 = arith.constant 0 : index
    %11 = vector.load %arg2[%10, %c0_13, %c0_14] : memref<50x1x16xf32, #tpu.memory_space<vmem>>, vector<1x1x16xf32>
    %12 = vector.shape_cast %11 : vector<1x1x16xf32> to vector<1x16xf32>
    %c1 = arith.constant 1 : index
    %c0_15 = arith.constant 0 : index
    %13 = memref.load %arg1[%c1, %c0_15] : memref<2x8xi32, #tpu.memory_space<smem>>
    %14 = arith.index_cast %13 : i32 to index
    %c0_16 = arith.constant 0 : index
    %c0_17 = arith.constant 0 : index
    %15 = vector.load %arg2[%14, %c0_16, %c0_17] : memref<50x1x16xf32, #tpu.memory_space<vmem>>, vector<1x1x16xf32>
    %16 = vector.shape_cast %15 : vector<1x1x16xf32> to vector<1x16xf32>
    %17 = tpu.concatenate %12, %16 in 0 : vector<1x16xf32>, vector<1x16xf32> -> vector<2x16xf32>
    %18 = tpu.concatenate %17, %4 in 0 : vector<2x16xf32>, vector<6x16xf32> -> vector<8x16xf32>
    %19 = tpu.concatenate %18, %5 in 1 : vector<8x16xf32>, vector<8x32xf32> -> vector<8x48xf32>
    %cst_18 = arith.constant dense<0.000000e+00> : vector<8x128xf32>
    %20 = tpu.matmul %19, %0, %cst_18 {dimension_numbers = #tpu.dot_dimension_numbers<[1], [0], [0], [1], [0, 0, 1, 1], [], []>} : vector<8x48xf32>, vector<48x128xf32>, vector<8x128xf32> -> vector<8x128xf32>
    %21 = vector.broadcast %2 : vector<1x128xf32> to vector<8x128xf32>
    %22 = arith.addf %20, %21 : vector<8x128xf32>
    %23 = arith.negf %22 : vector<8x128xf32>
    %24 = math.exp %23 : vector<8x128xf32>
    %cst_19 = arith.constant 1.000000e+00 : f32
    %25 = vector.broadcast %cst_19 : f32 to vector<8x128xf32>
    %26 = arith.addf %25, %24 : vector<8x128xf32>
    %27 = arith.divf %25, %26 : vector<8x128xf32>
    %28 = math.tanh %22 : vector<8x128xf32>
    %29 = vector.extract_strided_slice %27 {offsets = [0, 0], sizes = [8, 32], strides = [1, 1]} : vector<8x128xf32> to vector<8x32xf32>
    %30 = vector.extract_strided_slice %27 {offsets = [0, 32], sizes = [8, 32], strides = [1, 1]} : vector<8x128xf32> to vector<8x32xf32>
    %31 = vector.extract_strided_slice %28 {offsets = [0, 64], sizes = [8, 32], strides = [1, 1]} : vector<8x128xf32> to vector<8x32xf32>
    %32 = vector.extract_strided_slice %27 {offsets = [0, 96], sizes = [8, 32], strides = [1, 1]} : vector<8x128xf32> to vector<8x32xf32>
    %33 = arith.mulf %30, %7 : vector<8x32xf32>
    %34 = arith.mulf %29, %31 : vector<8x32xf32>
    %35 = arith.addf %33, %34 : vector<8x32xf32>
    %36 = math.tanh %35 : vector<8x32xf32>
    %37 = arith.mulf %32, %36 : vector<8x32xf32>
    %38 = tpu.concatenate %37, %6 in 1 : vector<8x32xf32>, vector<8x32xf32> -> vector<8x64xf32>
    %cst_20 = arith.constant dense<0.000000e+00> : vector<8x128xf32>
    %39 = tpu.matmul %38, %1, %cst_20 {dimension_numbers = #tpu.dot_dimension_numbers<[1], [0], [0], [1], [0, 0, 1, 1], [], []>} : vector<8x64xf32>, vector<64x128xf32>, vector<8x128xf32> -> vector<8x128xf32>
    %40 = vector.broadcast %3 : vector<1x128xf32> to vector<8x128xf32>
    %41 = arith.addf %39, %40 : vector<8x128xf32>
    %42 = arith.negf %41 : vector<8x128xf32>
    %43 = math.exp %42 : vector<8x128xf32>
    %cst_21 = arith.constant 1.000000e+00 : f32
    %44 = vector.broadcast %cst_21 : f32 to vector<8x128xf32>
    %45 = arith.addf %44, %43 : vector<8x128xf32>
    %46 = arith.divf %44, %45 : vector<8x128xf32>
    %47 = math.tanh %41 : vector<8x128xf32>
    %48 = vector.extract_strided_slice %46 {offsets = [0, 0], sizes = [8, 32], strides = [1, 1]} : vector<8x128xf32> to vector<8x32xf32>
    %49 = vector.extract_strided_slice %46 {offsets = [0, 32], sizes = [8, 32], strides = [1, 1]} : vector<8x128xf32> to vector<8x32xf32>
    %50 = vector.extract_strided_slice %47 {offsets = [0, 64], sizes = [8, 32], strides = [1, 1]} : vector<8x128xf32> to vector<8x32xf32>
    %51 = vector.extract_strided_slice %46 {offsets = [0, 96], sizes = [8, 32], strides = [1, 1]} : vector<8x128xf32> to vector<8x32xf32>
    %52 = arith.mulf %49, %8 : vector<8x32xf32>
    %53 = arith.mulf %48, %50 : vector<8x32xf32>
    %54 = arith.addf %52, %53 : vector<8x32xf32>
    %55 = math.tanh %54 : vector<8x32xf32>
    %56 = arith.mulf %51, %55 : vector<8x32xf32>
    %c0_22 = arith.constant 0 : index
    %c1_23 = arith.constant 1 : index
    %57 = memref.load %arg1[%c0_22, %c1_23] : memref<2x8xi32, #tpu.memory_space<smem>>
    %58 = arith.index_cast %57 : i32 to index
    %c0_24 = arith.constant 0 : index
    %c0_25 = arith.constant 0 : index
    %59 = vector.load %arg2[%58, %c0_24, %c0_25] : memref<50x1x16xf32, #tpu.memory_space<vmem>>, vector<1x1x16xf32>
    %60 = vector.shape_cast %59 : vector<1x1x16xf32> to vector<1x16xf32>
    %c1_26 = arith.constant 1 : index
    %c1_27 = arith.constant 1 : index
    %61 = memref.load %arg1[%c1_26, %c1_27] : memref<2x8xi32, #tpu.memory_space<smem>>
    %62 = arith.index_cast %61 : i32 to index
    %c0_28 = arith.constant 0 : index
    %c0_29 = arith.constant 0 : index
    %63 = vector.load %arg2[%62, %c0_28, %c0_29] : memref<50x1x16xf32, #tpu.memory_space<vmem>>, vector<1x1x16xf32>
    %64 = vector.shape_cast %63 : vector<1x1x16xf32> to vector<1x16xf32>
    %65 = tpu.concatenate %60, %64 in 0 : vector<1x16xf32>, vector<1x16xf32> -> vector<2x16xf32>
    %66 = tpu.concatenate %65, %4 in 0 : vector<2x16xf32>, vector<6x16xf32> -> vector<8x16xf32>
    %67 = tpu.concatenate %66, %37 in 1 : vector<8x16xf32>, vector<8x32xf32> -> vector<8x48xf32>
    %cst_30 = arith.constant dense<0.000000e+00> : vector<8x128xf32>
    %68 = tpu.matmul %67, %0, %cst_30 {dimension_numbers = #tpu.dot_dimension_numbers<[1], [0], [0], [1], [0, 0, 1, 1], [], []>} : vector<8x48xf32>, vector<48x128xf32>, vector<8x128xf32> -> vector<8x128xf32>
    %69 = vector.broadcast %2 : vector<1x128xf32> to vector<8x128xf32>
    %70 = arith.addf %68, %69 : vector<8x128xf32>
    %71 = arith.negf %70 : vector<8x128xf32>
    %72 = math.exp %71 : vector<8x128xf32>
    %cst_31 = arith.constant 1.000000e+00 : f32
    %73 = vector.broadcast %cst_31 : f32 to vector<8x128xf32>
    %74 = arith.addf %73, %72 : vector<8x128xf32>
    %75 = arith.divf %73, %74 : vector<8x128xf32>
    %76 = math.tanh %70 : vector<8x128xf32>
    %77 = vector.extract_strided_slice %75 {offsets = [0, 0], sizes = [8, 32], strides = [1, 1]} : vector<8x128xf32> to vector<8x32xf32>
    %78 = vector.extract_strided_slice %75 {offsets = [0, 32], sizes = [8, 32], strides = [1, 1]} : vector<8x128xf32> to vector<8x32xf32>
    %79 = vector.extract_strided_slice %76 {offsets = [0, 64], sizes = [8, 32], strides = [1, 1]} : vector<8x128xf32> to vector<8x32xf32>
    %80 = vector.extract_strided_slice %75 {offsets = [0, 96], sizes = [8, 32], strides = [1, 1]} : vector<8x128xf32> to vector<8x32xf32>
    %81 = arith.mulf %78, %35 : vector<8x32xf32>
    %82 = arith.mulf %77, %79 : vector<8x32xf32>
    %83 = arith.addf %81, %82 : vector<8x32xf32>
    %84 = math.tanh %83 : vector<8x32xf32>
    %85 = arith.mulf %80, %84 : vector<8x32xf32>
    %86 = tpu.concatenate %85, %56 in 1 : vector<8x32xf32>, vector<8x32xf32> -> vector<8x64xf32>
    %cst_32 = arith.constant dense<0.000000e+00> : vector<8x128xf32>
    %87 = tpu.matmul %86, %1, %cst_32 {dimension_numbers = #tpu.dot_dimension_numbers<[1], [0], [0], [1], [0, 0, 1, 1], [], []>} : vector<8x64xf32>, vector<64x128xf32>, vector<8x128xf32> -> vector<8x128xf32>
    %88 = vector.broadcast %3 : vector<1x128xf32> to vector<8x128xf32>
    %89 = arith.addf %87, %88 : vector<8x128xf32>
    %90 = arith.negf %89 : vector<8x128xf32>
    %91 = math.exp %90 : vector<8x128xf32>
    %cst_33 = arith.constant 1.000000e+00 : f32
    %92 = vector.broadcast %cst_33 : f32 to vector<8x128xf32>
    %93 = arith.addf %92, %91 : vector<8x128xf32>
    %94 = arith.divf %92, %93 : vector<8x128xf32>
    %95 = math.tanh %89 : vector<8x128xf32>
    %96 = vector.extract_strided_slice %94 {offsets = [0, 0], sizes = [8, 32], strides = [1, 1]} : vector<8x128xf32> to vector<8x32xf32>
    %97 = vector.extract_strided_slice %94 {offsets = [0, 32], sizes = [8, 32], strides = [1, 1]} : vector<8x128xf32> to vector<8x32xf32>
    %98 = vector.extract_strided_slice %95 {offsets = [0, 64], sizes = [8, 32], strides = [1, 1]} : vector<8x128xf32> to vector<8x32xf32>
    %99 = vector.extract_strided_slice %94 {offsets = [0, 96], sizes = [8, 32], strides = [1, 1]} : vector<8x128xf32> to vector<8x32xf32>
    %100 = arith.mulf %97, %54 : vector<8x32xf32>
    %101 = arith.mulf %96, %98 : vector<8x32xf32>
    %102 = arith.addf %100, %101 : vector<8x32xf32>
    %103 = math.tanh %102 : vector<8x32xf32>
    %104 = arith.mulf %99, %103 : vector<8x32xf32>
    %c0_34 = arith.constant 0 : index
    %c2 = arith.constant 2 : index
    %105 = memref.load %arg1[%c0_34, %c2] : memref<2x8xi32, #tpu.memory_space<smem>>
    %106 = arith.index_cast %105 : i32 to index
    %c0_35 = arith.constant 0 : index
    %c0_36 = arith.constant 0 : index
    %107 = vector.load %arg2[%106, %c0_35, %c0_36] : memref<50x1x16xf32, #tpu.memory_space<vmem>>, vector<1x1x16xf32>
    %108 = vector.shape_cast %107 : vector<1x1x16xf32> to vector<1x16xf32>
    %c1_37 = arith.constant 1 : index
    %c2_38 = arith.constant 2 : index
    %109 = memref.load %arg1[%c1_37, %c2_38] : memref<2x8xi32, #tpu.memory_space<smem>>
    %110 = arith.index_cast %109 : i32 to index
    %c0_39 = arith.constant 0 : index
    %c0_40 = arith.constant 0 : index
    %111 = vector.load %arg2[%110, %c0_39, %c0_40] : memref<50x1x16xf32, #tpu.memory_space<vmem>>, vector<1x1x16xf32>
    %112 = vector.shape_cast %111 : vector<1x1x16xf32> to vector<1x16xf32>
    %113 = tpu.concatenate %108, %112 in 0 : vector<1x16xf32>, vector<1x16xf32> -> vector<2x16xf32>
    %114 = tpu.concatenate %113, %4 in 0 : vector<2x16xf32>, vector<6x16xf32> -> vector<8x16xf32>
    %115 = tpu.concatenate %114, %85 in 1 : vector<8x16xf32>, vector<8x32xf32> -> vector<8x48xf32>
    %cst_41 = arith.constant dense<0.000000e+00> : vector<8x128xf32>
    %116 = tpu.matmul %115, %0, %cst_41 {dimension_numbers = #tpu.dot_dimension_numbers<[1], [0], [0], [1], [0, 0, 1, 1], [], []>} : vector<8x48xf32>, vector<48x128xf32>, vector<8x128xf32> -> vector<8x128xf32>
    %117 = vector.broadcast %2 : vector<1x128xf32> to vector<8x128xf32>
    %118 = arith.addf %116, %117 : vector<8x128xf32>
    %119 = arith.negf %118 : vector<8x128xf32>
    %120 = math.exp %119 : vector<8x128xf32>
    %cst_42 = arith.constant 1.000000e+00 : f32
    %121 = vector.broadcast %cst_42 : f32 to vector<8x128xf32>
    %122 = arith.addf %121, %120 : vector<8x128xf32>
    %123 = arith.divf %121, %122 : vector<8x128xf32>
    %124 = math.tanh %118 : vector<8x128xf32>
    %125 = vector.extract_strided_slice %123 {offsets = [0, 0], sizes = [8, 32], strides = [1, 1]} : vector<8x128xf32> to vector<8x32xf32>
    %126 = vector.extract_strided_slice %123 {offsets = [0, 32], sizes = [8, 32], strides = [1, 1]} : vector<8x128xf32> to vector<8x32xf32>
    %127 = vector.extract_strided_slice %124 {offsets = [0, 64], sizes = [8, 32], strides = [1, 1]} : vector<8x128xf32> to vector<8x32xf32>
    %128 = vector.extract_strided_slice %123 {offsets = [0, 96], sizes = [8, 32], strides = [1, 1]} : vector<8x128xf32> to vector<8x32xf32>
    %129 = arith.mulf %126, %83 : vector<8x32xf32>
    %130 = arith.mulf %125, %127 : vector<8x32xf32>
    %131 = arith.addf %129, %130 : vector<8x32xf32>
    %132 = math.tanh %131 : vector<8x32xf32>
    %133 = arith.mulf %128, %132 : vector<8x32xf32>
    %134 = tpu.concatenate %133, %104 in 1 : vector<8x32xf32>, vector<8x32xf32> -> vector<8x64xf32>
    %cst_43 = arith.constant dense<0.000000e+00> : vector<8x128xf32>
    %135 = tpu.matmul %134, %1, %cst_43 {dimension_numbers = #tpu.dot_dimension_numbers<[1], [0], [0], [1], [0, 0, 1, 1], [], []>} : vector<8x64xf32>, vector<64x128xf32>, vector<8x128xf32> -> vector<8x128xf32>
    %136 = vector.broadcast %3 : vector<1x128xf32> to vector<8x128xf32>
    %137 = arith.addf %135, %136 : vector<8x128xf32>
    %138 = arith.negf %137 : vector<8x128xf32>
    %139 = math.exp %138 : vector<8x128xf32>
    %cst_44 = arith.constant 1.000000e+00 : f32
    %140 = vector.broadcast %cst_44 : f32 to vector<8x128xf32>
    %141 = arith.addf %140, %139 : vector<8x128xf32>
    %142 = arith.divf %140, %141 : vector<8x128xf32>
    %143 = math.tanh %137 : vector<8x128xf32>
    %144 = vector.extract_strided_slice %142 {offsets = [0, 0], sizes = [8, 32], strides = [1, 1]} : vector<8x128xf32> to vector<8x32xf32>
    %145 = vector.extract_strided_slice %142 {offsets = [0, 32], sizes = [8, 32], strides = [1, 1]} : vector<8x128xf32> to vector<8x32xf32>
    %146 = vector.extract_strided_slice %143 {offsets = [0, 64], sizes = [8, 32], strides = [1, 1]} : vector<8x128xf32> to vector<8x32xf32>
    %147 = vector.extract_strided_slice %142 {offsets = [0, 96], sizes = [8, 32], strides = [1, 1]} : vector<8x128xf32> to vector<8x32xf32>
    %148 = arith.mulf %145, %102 : vector<8x32xf32>
    %149 = arith.mulf %144, %146 : vector<8x32xf32>
    %150 = arith.addf %148, %149 : vector<8x32xf32>
    %151 = math.tanh %150 : vector<8x32xf32>
    %152 = arith.mulf %147, %151 : vector<8x32xf32>
    %c0_45 = arith.constant 0 : index
    %c3 = arith.constant 3 : index
    %153 = memref.load %arg1[%c0_45, %c3] : memref<2x8xi32, #tpu.memory_space<smem>>
    %154 = arith.index_cast %153 : i32 to index
    %c0_46 = arith.constant 0 : index
    %c0_47 = arith.constant 0 : index
    %155 = vector.load %arg2[%154, %c0_46, %c0_47] : memref<50x1x16xf32, #tpu.memory_space<vmem>>, vector<1x1x16xf32>
    %156 = vector.shape_cast %155 : vector<1x1x16xf32> to vector<1x16xf32>
    %c1_48 = arith.constant 1 : index
    %c3_49 = arith.constant 3 : index
    %157 = memref.load %arg1[%c1_48, %c3_49] : memref<2x8xi32, #tpu.memory_space<smem>>
    %158 = arith.index_cast %157 : i32 to index
    %c0_50 = arith.constant 0 : index
    %c0_51 = arith.constant 0 : index
    %159 = vector.load %arg2[%158, %c0_50, %c0_51] : memref<50x1x16xf32, #tpu.memory_space<vmem>>, vector<1x1x16xf32>
    %160 = vector.shape_cast %159 : vector<1x1x16xf32> to vector<1x16xf32>
    %161 = tpu.concatenate %156, %160 in 0 : vector<1x16xf32>, vector<1x16xf32> -> vector<2x16xf32>
    %162 = tpu.concatenate %161, %4 in 0 : vector<2x16xf32>, vector<6x16xf32> -> vector<8x16xf32>
    %163 = tpu.concatenate %162, %133 in 1 : vector<8x16xf32>, vector<8x32xf32> -> vector<8x48xf32>
    %cst_52 = arith.constant dense<0.000000e+00> : vector<8x128xf32>
    %164 = tpu.matmul %163, %0, %cst_52 {dimension_numbers = #tpu.dot_dimension_numbers<[1], [0], [0], [1], [0, 0, 1, 1], [], []>} : vector<8x48xf32>, vector<48x128xf32>, vector<8x128xf32> -> vector<8x128xf32>
    %165 = vector.broadcast %2 : vector<1x128xf32> to vector<8x128xf32>
    %166 = arith.addf %164, %165 : vector<8x128xf32>
    %167 = arith.negf %166 : vector<8x128xf32>
    %168 = math.exp %167 : vector<8x128xf32>
    %cst_53 = arith.constant 1.000000e+00 : f32
    %169 = vector.broadcast %cst_53 : f32 to vector<8x128xf32>
    %170 = arith.addf %169, %168 : vector<8x128xf32>
    %171 = arith.divf %169, %170 : vector<8x128xf32>
    %172 = math.tanh %166 : vector<8x128xf32>
    %173 = vector.extract_strided_slice %171 {offsets = [0, 0], sizes = [8, 32], strides = [1, 1]} : vector<8x128xf32> to vector<8x32xf32>
    %174 = vector.extract_strided_slice %171 {offsets = [0, 32], sizes = [8, 32], strides = [1, 1]} : vector<8x128xf32> to vector<8x32xf32>
    %175 = vector.extract_strided_slice %172 {offsets = [0, 64], sizes = [8, 32], strides = [1, 1]} : vector<8x128xf32> to vector<8x32xf32>
    %176 = vector.extract_strided_slice %171 {offsets = [0, 96], sizes = [8, 32], strides = [1, 1]} : vector<8x128xf32> to vector<8x32xf32>
    %177 = arith.mulf %174, %131 : vector<8x32xf32>
    %178 = arith.mulf %173, %175 : vector<8x32xf32>
    %179 = arith.addf %177, %178 : vector<8x32xf32>
    %180 = math.tanh %179 : vector<8x32xf32>
    %181 = arith.mulf %176, %180 : vector<8x32xf32>
    %182 = tpu.concatenate %181, %152 in 1 : vector<8x32xf32>, vector<8x32xf32> -> vector<8x64xf32>
    %cst_54 = arith.constant dense<0.000000e+00> : vector<8x128xf32>
    %183 = tpu.matmul %182, %1, %cst_54 {dimension_numbers = #tpu.dot_dimension_numbers<[1], [0], [0], [1], [0, 0, 1, 1], [], []>} : vector<8x64xf32>, vector<64x128xf32>, vector<8x128xf32> -> vector<8x128xf32>
    %184 = vector.broadcast %3 : vector<1x128xf32> to vector<8x128xf32>
    %185 = arith.addf %183, %184 : vector<8x128xf32>
    %186 = arith.negf %185 : vector<8x128xf32>
    %187 = math.exp %186 : vector<8x128xf32>
    %cst_55 = arith.constant 1.000000e+00 : f32
    %188 = vector.broadcast %cst_55 : f32 to vector<8x128xf32>
    %189 = arith.addf %188, %187 : vector<8x128xf32>
    %190 = arith.divf %188, %189 : vector<8x128xf32>
    %191 = math.tanh %185 : vector<8x128xf32>
    %192 = vector.extract_strided_slice %190 {offsets = [0, 0], sizes = [8, 32], strides = [1, 1]} : vector<8x128xf32> to vector<8x32xf32>
    %193 = vector.extract_strided_slice %190 {offsets = [0, 32], sizes = [8, 32], strides = [1, 1]} : vector<8x128xf32> to vector<8x32xf32>
    %194 = vector.extract_strided_slice %191 {offsets = [0, 64], sizes = [8, 32], strides = [1, 1]} : vector<8x128xf32> to vector<8x32xf32>
    %195 = vector.extract_strided_slice %190 {offsets = [0, 96], sizes = [8, 32], strides = [1, 1]} : vector<8x128xf32> to vector<8x32xf32>
    %196 = arith.mulf %193, %150 : vector<8x32xf32>
    %197 = arith.mulf %192, %194 : vector<8x32xf32>
    %198 = arith.addf %196, %197 : vector<8x32xf32>
    %199 = math.tanh %198 : vector<8x32xf32>
    %200 = arith.mulf %195, %199 : vector<8x32xf32>
    %c0_56 = arith.constant 0 : index
    %c4 = arith.constant 4 : index
    %201 = memref.load %arg1[%c0_56, %c4] : memref<2x8xi32, #tpu.memory_space<smem>>
    %202 = arith.index_cast %201 : i32 to index
    %c0_57 = arith.constant 0 : index
    %c0_58 = arith.constant 0 : index
    %203 = vector.load %arg2[%202, %c0_57, %c0_58] : memref<50x1x16xf32, #tpu.memory_space<vmem>>, vector<1x1x16xf32>
    %204 = vector.shape_cast %203 : vector<1x1x16xf32> to vector<1x16xf32>
    %c1_59 = arith.constant 1 : index
    %c4_60 = arith.constant 4 : index
    %205 = memref.load %arg1[%c1_59, %c4_60] : memref<2x8xi32, #tpu.memory_space<smem>>
    %206 = arith.index_cast %205 : i32 to index
    %c0_61 = arith.constant 0 : index
    %c0_62 = arith.constant 0 : index
    %207 = vector.load %arg2[%206, %c0_61, %c0_62] : memref<50x1x16xf32, #tpu.memory_space<vmem>>, vector<1x1x16xf32>
    %208 = vector.shape_cast %207 : vector<1x1x16xf32> to vector<1x16xf32>
    %209 = tpu.concatenate %204, %208 in 0 : vector<1x16xf32>, vector<1x16xf32> -> vector<2x16xf32>
    %210 = tpu.concatenate %209, %4 in 0 : vector<2x16xf32>, vector<6x16xf32> -> vector<8x16xf32>
    %211 = tpu.concatenate %210, %181 in 1 : vector<8x16xf32>, vector<8x32xf32> -> vector<8x48xf32>
    %cst_63 = arith.constant dense<0.000000e+00> : vector<8x128xf32>
    %212 = tpu.matmul %211, %0, %cst_63 {dimension_numbers = #tpu.dot_dimension_numbers<[1], [0], [0], [1], [0, 0, 1, 1], [], []>} : vector<8x48xf32>, vector<48x128xf32>, vector<8x128xf32> -> vector<8x128xf32>
    %213 = vector.broadcast %2 : vector<1x128xf32> to vector<8x128xf32>
    %214 = arith.addf %212, %213 : vector<8x128xf32>
    %215 = arith.negf %214 : vector<8x128xf32>
    %216 = math.exp %215 : vector<8x128xf32>
    %cst_64 = arith.constant 1.000000e+00 : f32
    %217 = vector.broadcast %cst_64 : f32 to vector<8x128xf32>
    %218 = arith.addf %217, %216 : vector<8x128xf32>
    %219 = arith.divf %217, %218 : vector<8x128xf32>
    %220 = math.tanh %214 : vector<8x128xf32>
    %221 = vector.extract_strided_slice %219 {offsets = [0, 0], sizes = [8, 32], strides = [1, 1]} : vector<8x128xf32> to vector<8x32xf32>
    %222 = vector.extract_strided_slice %219 {offsets = [0, 32], sizes = [8, 32], strides = [1, 1]} : vector<8x128xf32> to vector<8x32xf32>
    %223 = vector.extract_strided_slice %220 {offsets = [0, 64], sizes = [8, 32], strides = [1, 1]} : vector<8x128xf32> to vector<8x32xf32>
    %224 = vector.extract_strided_slice %219 {offsets = [0, 96], sizes = [8, 32], strides = [1, 1]} : vector<8x128xf32> to vector<8x32xf32>
    %225 = arith.mulf %222, %179 : vector<8x32xf32>
    %226 = arith.mulf %221, %223 : vector<8x32xf32>
    %227 = arith.addf %225, %226 : vector<8x32xf32>
    %228 = math.tanh %227 : vector<8x32xf32>
    %229 = arith.mulf %224, %228 : vector<8x32xf32>
    %230 = tpu.concatenate %229, %200 in 1 : vector<8x32xf32>, vector<8x32xf32> -> vector<8x64xf32>
    %cst_65 = arith.constant dense<0.000000e+00> : vector<8x128xf32>
    %231 = tpu.matmul %230, %1, %cst_65 {dimension_numbers = #tpu.dot_dimension_numbers<[1], [0], [0], [1], [0, 0, 1, 1], [], []>} : vector<8x64xf32>, vector<64x128xf32>, vector<8x128xf32> -> vector<8x128xf32>
    %232 = vector.broadcast %3 : vector<1x128xf32> to vector<8x128xf32>
    %233 = arith.addf %231, %232 : vector<8x128xf32>
    %234 = arith.negf %233 : vector<8x128xf32>
    %235 = math.exp %234 : vector<8x128xf32>
    %cst_66 = arith.constant 1.000000e+00 : f32
    %236 = vector.broadcast %cst_66 : f32 to vector<8x128xf32>
    %237 = arith.addf %236, %235 : vector<8x128xf32>
    %238 = arith.divf %236, %237 : vector<8x128xf32>
    %239 = math.tanh %233 : vector<8x128xf32>
    %240 = vector.extract_strided_slice %238 {offsets = [0, 0], sizes = [8, 32], strides = [1, 1]} : vector<8x128xf32> to vector<8x32xf32>
    %241 = vector.extract_strided_slice %238 {offsets = [0, 32], sizes = [8, 32], strides = [1, 1]} : vector<8x128xf32> to vector<8x32xf32>
    %242 = vector.extract_strided_slice %239 {offsets = [0, 64], sizes = [8, 32], strides = [1, 1]} : vector<8x128xf32> to vector<8x32xf32>
    %243 = vector.extract_strided_slice %238 {offsets = [0, 96], sizes = [8, 32], strides = [1, 1]} : vector<8x128xf32> to vector<8x32xf32>
    %244 = arith.mulf %241, %198 : vector<8x32xf32>
    %245 = arith.mulf %240, %242 : vector<8x32xf32>
    %246 = arith.addf %244, %245 : vector<8x32xf32>
    %247 = math.tanh %246 : vector<8x32xf32>
    %248 = arith.mulf %243, %247 : vector<8x32xf32>
    %c0_67 = arith.constant 0 : index
    %c5 = arith.constant 5 : index
    %249 = memref.load %arg1[%c0_67, %c5] : memref<2x8xi32, #tpu.memory_space<smem>>
    %250 = arith.index_cast %249 : i32 to index
    %c0_68 = arith.constant 0 : index
    %c0_69 = arith.constant 0 : index
    %251 = vector.load %arg2[%250, %c0_68, %c0_69] : memref<50x1x16xf32, #tpu.memory_space<vmem>>, vector<1x1x16xf32>
    %252 = vector.shape_cast %251 : vector<1x1x16xf32> to vector<1x16xf32>
    %c1_70 = arith.constant 1 : index
    %c5_71 = arith.constant 5 : index
    %253 = memref.load %arg1[%c1_70, %c5_71] : memref<2x8xi32, #tpu.memory_space<smem>>
    %254 = arith.index_cast %253 : i32 to index
    %c0_72 = arith.constant 0 : index
    %c0_73 = arith.constant 0 : index
    %255 = vector.load %arg2[%254, %c0_72, %c0_73] : memref<50x1x16xf32, #tpu.memory_space<vmem>>, vector<1x1x16xf32>
    %256 = vector.shape_cast %255 : vector<1x1x16xf32> to vector<1x16xf32>
    %257 = tpu.concatenate %252, %256 in 0 : vector<1x16xf32>, vector<1x16xf32> -> vector<2x16xf32>
    %258 = tpu.concatenate %257, %4 in 0 : vector<2x16xf32>, vector<6x16xf32> -> vector<8x16xf32>
    %259 = tpu.concatenate %258, %229 in 1 : vector<8x16xf32>, vector<8x32xf32> -> vector<8x48xf32>
    %cst_74 = arith.constant dense<0.000000e+00> : vector<8x128xf32>
    %260 = tpu.matmul %259, %0, %cst_74 {dimension_numbers = #tpu.dot_dimension_numbers<[1], [0], [0], [1], [0, 0, 1, 1], [], []>} : vector<8x48xf32>, vector<48x128xf32>, vector<8x128xf32> -> vector<8x128xf32>
    %261 = vector.broadcast %2 : vector<1x128xf32> to vector<8x128xf32>
    %262 = arith.addf %260, %261 : vector<8x128xf32>
    %263 = arith.negf %262 : vector<8x128xf32>
    %264 = math.exp %263 : vector<8x128xf32>
    %cst_75 = arith.constant 1.000000e+00 : f32
    %265 = vector.broadcast %cst_75 : f32 to vector<8x128xf32>
    %266 = arith.addf %265, %264 : vector<8x128xf32>
    %267 = arith.divf %265, %266 : vector<8x128xf32>
    %268 = math.tanh %262 : vector<8x128xf32>
    %269 = vector.extract_strided_slice %267 {offsets = [0, 0], sizes = [8, 32], strides = [1, 1]} : vector<8x128xf32> to vector<8x32xf32>
    %270 = vector.extract_strided_slice %267 {offsets = [0, 32], sizes = [8, 32], strides = [1, 1]} : vector<8x128xf32> to vector<8x32xf32>
    %271 = vector.extract_strided_slice %268 {offsets = [0, 64], sizes = [8, 32], strides = [1, 1]} : vector<8x128xf32> to vector<8x32xf32>
    %272 = vector.extract_strided_slice %267 {offsets = [0, 96], sizes = [8, 32], strides = [1, 1]} : vector<8x128xf32> to vector<8x32xf32>
    %273 = arith.mulf %270, %227 : vector<8x32xf32>
    %274 = arith.mulf %269, %271 : vector<8x32xf32>
    %275 = arith.addf %273, %274 : vector<8x32xf32>
    %276 = math.tanh %275 : vector<8x32xf32>
    %277 = arith.mulf %272, %276 : vector<8x32xf32>
    %278 = tpu.concatenate %277, %248 in 1 : vector<8x32xf32>, vector<8x32xf32> -> vector<8x64xf32>
    %cst_76 = arith.constant dense<0.000000e+00> : vector<8x128xf32>
    %279 = tpu.matmul %278, %1, %cst_76 {dimension_numbers = #tpu.dot_dimension_numbers<[1], [0], [0], [1], [0, 0, 1, 1], [], []>} : vector<8x64xf32>, vector<64x128xf32>, vector<8x128xf32> -> vector<8x128xf32>
    %280 = vector.broadcast %3 : vector<1x128xf32> to vector<8x128xf32>
    %281 = arith.addf %279, %280 : vector<8x128xf32>
    %282 = arith.negf %281 : vector<8x128xf32>
    %283 = math.exp %282 : vector<8x128xf32>
    %cst_77 = arith.constant 1.000000e+00 : f32
    %284 = vector.broadcast %cst_77 : f32 to vector<8x128xf32>
    %285 = arith.addf %284, %283 : vector<8x128xf32>
    %286 = arith.divf %284, %285 : vector<8x128xf32>
    %287 = math.tanh %281 : vector<8x128xf32>
    %288 = vector.extract_strided_slice %286 {offsets = [0, 0], sizes = [8, 32], strides = [1, 1]} : vector<8x128xf32> to vector<8x32xf32>
    %289 = vector.extract_strided_slice %286 {offsets = [0, 32], sizes = [8, 32], strides = [1, 1]} : vector<8x128xf32> to vector<8x32xf32>
    %290 = vector.extract_strided_slice %287 {offsets = [0, 64], sizes = [8, 32], strides = [1, 1]} : vector<8x128xf32> to vector<8x32xf32>
    %291 = vector.extract_strided_slice %286 {offsets = [0, 96], sizes = [8, 32], strides = [1, 1]} : vector<8x128xf32> to vector<8x32xf32>
    %292 = arith.mulf %289, %246 : vector<8x32xf32>
    %293 = arith.mulf %288, %290 : vector<8x32xf32>
    %294 = arith.addf %292, %293 : vector<8x32xf32>
    %295 = math.tanh %294 : vector<8x32xf32>
    %296 = arith.mulf %291, %295 : vector<8x32xf32>
    %c0_78 = arith.constant 0 : index
    %c6 = arith.constant 6 : index
    %297 = memref.load %arg1[%c0_78, %c6] : memref<2x8xi32, #tpu.memory_space<smem>>
    %298 = arith.index_cast %297 : i32 to index
    %c0_79 = arith.constant 0 : index
    %c0_80 = arith.constant 0 : index
    %299 = vector.load %arg2[%298, %c0_79, %c0_80] : memref<50x1x16xf32, #tpu.memory_space<vmem>>, vector<1x1x16xf32>
    %300 = vector.shape_cast %299 : vector<1x1x16xf32> to vector<1x16xf32>
    %c1_81 = arith.constant 1 : index
    %c6_82 = arith.constant 6 : index
    %301 = memref.load %arg1[%c1_81, %c6_82] : memref<2x8xi32, #tpu.memory_space<smem>>
    %302 = arith.index_cast %301 : i32 to index
    %c0_83 = arith.constant 0 : index
    %c0_84 = arith.constant 0 : index
    %303 = vector.load %arg2[%302, %c0_83, %c0_84] : memref<50x1x16xf32, #tpu.memory_space<vmem>>, vector<1x1x16xf32>
    %304 = vector.shape_cast %303 : vector<1x1x16xf32> to vector<1x16xf32>
    %305 = tpu.concatenate %300, %304 in 0 : vector<1x16xf32>, vector<1x16xf32> -> vector<2x16xf32>
    %306 = tpu.concatenate %305, %4 in 0 : vector<2x16xf32>, vector<6x16xf32> -> vector<8x16xf32>
    %307 = tpu.concatenate %306, %277 in 1 : vector<8x16xf32>, vector<8x32xf32> -> vector<8x48xf32>
    %cst_85 = arith.constant dense<0.000000e+00> : vector<8x128xf32>
    %308 = tpu.matmul %307, %0, %cst_85 {dimension_numbers = #tpu.dot_dimension_numbers<[1], [0], [0], [1], [0, 0, 1, 1], [], []>} : vector<8x48xf32>, vector<48x128xf32>, vector<8x128xf32> -> vector<8x128xf32>
    %309 = vector.broadcast %2 : vector<1x128xf32> to vector<8x128xf32>
    %310 = arith.addf %308, %309 : vector<8x128xf32>
    %311 = arith.negf %310 : vector<8x128xf32>
    %312 = math.exp %311 : vector<8x128xf32>
    %cst_86 = arith.constant 1.000000e+00 : f32
    %313 = vector.broadcast %cst_86 : f32 to vector<8x128xf32>
    %314 = arith.addf %313, %312 : vector<8x128xf32>
    %315 = arith.divf %313, %314 : vector<8x128xf32>
    %316 = math.tanh %310 : vector<8x128xf32>
    %317 = vector.extract_strided_slice %315 {offsets = [0, 0], sizes = [8, 32], strides = [1, 1]} : vector<8x128xf32> to vector<8x32xf32>
    %318 = vector.extract_strided_slice %315 {offsets = [0, 32], sizes = [8, 32], strides = [1, 1]} : vector<8x128xf32> to vector<8x32xf32>
    %319 = vector.extract_strided_slice %316 {offsets = [0, 64], sizes = [8, 32], strides = [1, 1]} : vector<8x128xf32> to vector<8x32xf32>
    %320 = vector.extract_strided_slice %315 {offsets = [0, 96], sizes = [8, 32], strides = [1, 1]} : vector<8x128xf32> to vector<8x32xf32>
    %321 = arith.mulf %318, %275 : vector<8x32xf32>
    %322 = arith.mulf %317, %319 : vector<8x32xf32>
    %323 = arith.addf %321, %322 : vector<8x32xf32>
    %324 = math.tanh %323 : vector<8x32xf32>
    %325 = arith.mulf %320, %324 : vector<8x32xf32>
    %326 = tpu.concatenate %325, %296 in 1 : vector<8x32xf32>, vector<8x32xf32> -> vector<8x64xf32>
    %cst_87 = arith.constant dense<0.000000e+00> : vector<8x128xf32>
    %327 = tpu.matmul %326, %1, %cst_87 {dimension_numbers = #tpu.dot_dimension_numbers<[1], [0], [0], [1], [0, 0, 1, 1], [], []>} : vector<8x64xf32>, vector<64x128xf32>, vector<8x128xf32> -> vector<8x128xf32>
    %328 = vector.broadcast %3 : vector<1x128xf32> to vector<8x128xf32>
    %329 = arith.addf %327, %328 : vector<8x128xf32>
    %330 = arith.negf %329 : vector<8x128xf32>
    %331 = math.exp %330 : vector<8x128xf32>
    %cst_88 = arith.constant 1.000000e+00 : f32
    %332 = vector.broadcast %cst_88 : f32 to vector<8x128xf32>
    %333 = arith.addf %332, %331 : vector<8x128xf32>
    %334 = arith.divf %332, %333 : vector<8x128xf32>
    %335 = math.tanh %329 : vector<8x128xf32>
    %336 = vector.extract_strided_slice %334 {offsets = [0, 0], sizes = [8, 32], strides = [1, 1]} : vector<8x128xf32> to vector<8x32xf32>
    %337 = vector.extract_strided_slice %334 {offsets = [0, 32], sizes = [8, 32], strides = [1, 1]} : vector<8x128xf32> to vector<8x32xf32>
    %338 = vector.extract_strided_slice %335 {offsets = [0, 64], sizes = [8, 32], strides = [1, 1]} : vector<8x128xf32> to vector<8x32xf32>
    %339 = vector.extract_strided_slice %334 {offsets = [0, 96], sizes = [8, 32], strides = [1, 1]} : vector<8x128xf32> to vector<8x32xf32>
    %340 = arith.mulf %337, %294 : vector<8x32xf32>
    %341 = arith.mulf %336, %338 : vector<8x32xf32>
    %342 = arith.addf %340, %341 : vector<8x32xf32>
    %343 = math.tanh %342 : vector<8x32xf32>
    %344 = arith.mulf %339, %343 : vector<8x32xf32>
    %c0_89 = arith.constant 0 : index
    %c7 = arith.constant 7 : index
    %345 = memref.load %arg1[%c0_89, %c7] : memref<2x8xi32, #tpu.memory_space<smem>>
    %346 = arith.index_cast %345 : i32 to index
    %c0_90 = arith.constant 0 : index
    %c0_91 = arith.constant 0 : index
    %347 = vector.load %arg2[%346, %c0_90, %c0_91] : memref<50x1x16xf32, #tpu.memory_space<vmem>>, vector<1x1x16xf32>
    %348 = vector.shape_cast %347 : vector<1x1x16xf32> to vector<1x16xf32>
    %c1_92 = arith.constant 1 : index
    %c7_93 = arith.constant 7 : index
    %349 = memref.load %arg1[%c1_92, %c7_93] : memref<2x8xi32, #tpu.memory_space<smem>>
    %350 = arith.index_cast %349 : i32 to index
    %c0_94 = arith.constant 0 : index
    %c0_95 = arith.constant 0 : index
    %351 = vector.load %arg2[%350, %c0_94, %c0_95] : memref<50x1x16xf32, #tpu.memory_space<vmem>>, vector<1x1x16xf32>
    %352 = vector.shape_cast %351 : vector<1x1x16xf32> to vector<1x16xf32>
    %353 = tpu.concatenate %348, %352 in 0 : vector<1x16xf32>, vector<1x16xf32> -> vector<2x16xf32>
    %354 = tpu.concatenate %353, %4 in 0 : vector<2x16xf32>, vector<6x16xf32> -> vector<8x16xf32>
    %355 = tpu.concatenate %354, %325 in 1 : vector<8x16xf32>, vector<8x32xf32> -> vector<8x48xf32>
    %cst_96 = arith.constant dense<0.000000e+00> : vector<8x128xf32>
    %356 = tpu.matmul %355, %0, %cst_96 {dimension_numbers = #tpu.dot_dimension_numbers<[1], [0], [0], [1], [0, 0, 1, 1], [], []>} : vector<8x48xf32>, vector<48x128xf32>, vector<8x128xf32> -> vector<8x128xf32>
    %357 = vector.broadcast %2 : vector<1x128xf32> to vector<8x128xf32>
    %358 = arith.addf %356, %357 : vector<8x128xf32>
    %359 = arith.negf %358 : vector<8x128xf32>
    %360 = math.exp %359 : vector<8x128xf32>
    %cst_97 = arith.constant 1.000000e+00 : f32
    %361 = vector.broadcast %cst_97 : f32 to vector<8x128xf32>
    %362 = arith.addf %361, %360 : vector<8x128xf32>
    %363 = arith.divf %361, %362 : vector<8x128xf32>
    %364 = math.tanh %358 : vector<8x128xf32>
    %365 = vector.extract_strided_slice %363 {offsets = [0, 0], sizes = [8, 32], strides = [1, 1]} : vector<8x128xf32> to vector<8x32xf32>
    %366 = vector.extract_strided_slice %363 {offsets = [0, 32], sizes = [8, 32], strides = [1, 1]} : vector<8x128xf32> to vector<8x32xf32>
    %367 = vector.extract_strided_slice %364 {offsets = [0, 64], sizes = [8, 32], strides = [1, 1]} : vector<8x128xf32> to vector<8x32xf32>
    %368 = vector.extract_strided_slice %363 {offsets = [0, 96], sizes = [8, 32], strides = [1, 1]} : vector<8x128xf32> to vector<8x32xf32>
    %369 = arith.mulf %366, %323 : vector<8x32xf32>
    %370 = arith.mulf %365, %367 : vector<8x32xf32>
    %371 = arith.addf %369, %370 : vector<8x32xf32>
    %372 = math.tanh %371 : vector<8x32xf32>
    %373 = arith.mulf %368, %372 : vector<8x32xf32>
    %374 = tpu.concatenate %373, %344 in 1 : vector<8x32xf32>, vector<8x32xf32> -> vector<8x64xf32>
    %cst_98 = arith.constant dense<0.000000e+00> : vector<8x128xf32>
    %375 = tpu.matmul %374, %1, %cst_98 {dimension_numbers = #tpu.dot_dimension_numbers<[1], [0], [0], [1], [0, 0, 1, 1], [], []>} : vector<8x64xf32>, vector<64x128xf32>, vector<8x128xf32> -> vector<8x128xf32>
    %376 = vector.broadcast %3 : vector<1x128xf32> to vector<8x128xf32>
    %377 = arith.addf %375, %376 : vector<8x128xf32>
    %378 = arith.negf %377 : vector<8x128xf32>
    %379 = math.exp %378 : vector<8x128xf32>
    %cst_99 = arith.constant 1.000000e+00 : f32
    %380 = vector.broadcast %cst_99 : f32 to vector<8x128xf32>
    %381 = arith.addf %380, %379 : vector<8x128xf32>
    %382 = arith.divf %380, %381 : vector<8x128xf32>
    %383 = math.tanh %377 : vector<8x128xf32>
    %384 = vector.extract_strided_slice %382 {offsets = [0, 0], sizes = [8, 32], strides = [1, 1]} : vector<8x128xf32> to vector<8x32xf32>
    %385 = vector.extract_strided_slice %382 {offsets = [0, 32], sizes = [8, 32], strides = [1, 1]} : vector<8x128xf32> to vector<8x32xf32>
    %386 = vector.extract_strided_slice %383 {offsets = [0, 64], sizes = [8, 32], strides = [1, 1]} : vector<8x128xf32> to vector<8x32xf32>
    %387 = vector.extract_strided_slice %382 {offsets = [0, 96], sizes = [8, 32], strides = [1, 1]} : vector<8x128xf32> to vector<8x32xf32>
    %388 = arith.mulf %385, %342 : vector<8x32xf32>
    %389 = arith.mulf %384, %386 : vector<8x32xf32>
    %390 = arith.addf %388, %389 : vector<8x32xf32>
    %391 = math.tanh %390 : vector<8x32xf32>
    %392 = arith.mulf %387, %391 : vector<8x32xf32>
    %c0_100 = arith.constant 0 : index
    %c0_101 = arith.constant 0 : index
    %393 = vector.load %arg7[%c0_100, %c0_101] : memref<32x4xf32, #tpu.memory_space<vmem>>, vector<32x4xf32>
    %cst_102 = arith.constant dense<0.000000e+00> : vector<8x4xf32>
    %394 = tpu.matmul %392, %393, %cst_102 {dimension_numbers = #tpu.dot_dimension_numbers<[1], [0], [0], [1], [0, 0, 1, 1], [], []>} : vector<8x32xf32>, vector<32x4xf32>, vector<8x4xf32> -> vector<8x4xf32>
    %c0_103 = arith.constant 0 : index
    %c0_104 = arith.constant 0 : index
    %395 = vector.load %arg8[%c0_103, %c0_104] : memref<1x4xf32, #tpu.memory_space<vmem>>, vector<1x4xf32>
    %396 = vector.broadcast %395 : vector<1x4xf32> to vector<8x4xf32>
    %397 = arith.addf %394, %396 : vector<8x4xf32>
    %c0_105 = arith.constant 0 : index
    %c0_106 = arith.constant 0 : index
    %398 = vector.load %arg9[%c0_105, %c0_106] : memref<8x4xf32, #tpu.memory_space<vmem>>, vector<8x4xf32>
    tpu.vector_store %arg9[%c0_105, %c0_106], %397 {strides = array<i32>} : memref<8x4xf32, #tpu.memory_space<vmem>>, vector<8x4xf32>,
    return
  }
  func.func @transform_0(%arg0: i32, %arg1: memref<2x8xi32, #tpu.memory_space<smem>>) -> (i32, i32, i32) {
    %c0_i32 = arith.constant 0 : i32
    %c0_i32_0 = arith.constant 0 : i32
    %c0_i32_1 = arith.constant 0 : i32
    %c0_i32_2 = arith.constant 0 : i32
    return %c0_i32, %c0_i32_0, %c0_i32_1 : i32, i32, i32
  }
  func.func @transform_1(%arg0: i32, %arg1: memref<2x8xi32, #tpu.memory_space<smem>>) -> (i32, i32) {
    %c0_i32 = arith.constant 0 : i32
    %c0_i32_0 = arith.constant 0 : i32
    %c0_i32_1 = arith.constant 0 : i32
    return %c0_i32, %c0_i32_0 : i32, i32
  }
  func.func @transform_2(%arg0: i32, %arg1: memref<2x8xi32, #tpu.memory_space<smem>>) -> (i32, i32) {
    %c0_i32 = arith.constant 0 : i32
    %c0_i32_0 = arith.constant 0 : i32
    %c0_i32_1 = arith.constant 0 : i32
    return %c0_i32, %c0_i32_0 : i32, i32
  }
  func.func @transform_3(%arg0: i32, %arg1: memref<2x8xi32, #tpu.memory_space<smem>>) -> (i32, i32) {
    %c0_i32 = arith.constant 0 : i32
    %c0_i32_0 = arith.constant 0 : i32
    %c0_i32_1 = arith.constant 0 : i32
    return %c0_i32, %c0_i32_0 : i32, i32
  }
  func.func @transform_4(%arg0: i32, %arg1: memref<2x8xi32, #tpu.memory_space<smem>>) -> (i32, i32) {
    %c0_i32 = arith.constant 0 : i32
    %c0_i32_0 = arith.constant 0 : i32
    %c0_i32_1 = arith.constant 0 : i32
    return %c0_i32, %c0_i32_0 : i32, i32
  }
  func.func @transform_5(%arg0: i32, %arg1: memref<2x8xi32, #tpu.memory_space<smem>>) -> (i32, i32) {
    %c0_i32 = arith.constant 0 : i32
    %c0_i32_0 = arith.constant 0 : i32
    %c0_i32_1 = arith.constant 0 : i32
    return %c0_i32, %c0_i32_0 : i32, i32
  }
  func.func @transform_6(%arg0: i32, %arg1: memref<2x8xi32, #tpu.memory_space<smem>>) -> (i32, i32) {
    %c0_i32 = arith.constant 0 : i32
    %c0_i32_0 = arith.constant 0 : i32
    %c0_i32_1 = arith.constant 0 : i32
    return %c0_i32, %c0_i32_0 : i32, i32
  }
  func.func @transform_7(%arg0: i32, %arg1: memref<2x8xi32, #tpu.memory_space<smem>>) -> (i32, i32) {
    %c0_i32 = arith.constant 0 : i32
    %c0_i32_0 = arith.constant 0 : i32
    %c0_i32_1 = arith.constant 0 : i32
    return %c0_i32, %c0_i32_0 : i32, i32
  }
}

</mosaic_0001>

<bundles_post_ra>
// kernel: lstm_net_forward.1
= control target key start
LH: loop header
LB: loop body
LE: loop exit
PB: predicated region body
PF: predicated region fallthrough
CT: control target
= control target key end

     0   :  { %s1516_s30 = smov [#allocation3]   ;;  %s2020_s0 = inlined_call_operand.vmem [shape: s32[2,8], index: 0, kind: input, shape index: {}]   ;;  %s2021_s1 = inlined_call_operand.vmem [shape: f32[50,1,16], index: 1, kind: input, shape index: {}]   ;;  %s2022_s2 = inlined_call_operand.hbm [shape: f32[48,128], index: 2, kind: input, shape index: {}]   ;;  %s2023_s3 = inlined_call_operand.vmem [shape: f32[1,128], index: 3, kind: input, shape index: {}]   ;;  %s2024_s4 = inlined_call_operand.vmem [shape: f32[64,128], index: 4, kind: input, shape index: {}]   ;;  %s2025_s5 = inlined_call_operand.vmem [shape: f32[1,128], index: 5, kind: input, shape index: {}]   ;;  %s2026_s6 = inlined_call_operand.vmem [shape: f32[32,4], index: 6, kind: input, shape index: {}]   ;;  %s2027_s7 = inlined_call_operand.vmem [shape: f32[1,4], index: 7, kind: input, shape index: {}]   ;;  %s2028_s8 = inlined_call_operand.vmem [shape: f32[8,4], index: 8, kind: output, shape index: {}]  }
   0x1   :  { %s14_s29 = sshll.u32 %s2020_s0, 4  ;;  %s15_s29 = int_to_ptr.vmem [resolvable:$true] %s14_s29 }
   0x2   :  { %17 = dma.vmem_to_smem %s15_s29, 32, %s1516_s30, [#allocation2] }
   0x3   :  { %1512 = dma.done.wait [#allocation2], 32 }
   0x4   :  { %1513 = vsyncadd [#allocation2], 4294967264 }
   0x5   :  { %20 = sfence }
   0x6   :  { %21 = vsyncpa [#allocation5], 0  ;;  %s28_s11 = sshll.u32 %s2022_s2, 4  ;;  %s1517_s12 = smov [#allocation4]   ;;  %s29_s11 = int_to_ptr.hbm [resolvable:$true] %s28_s11 }
   0x7   :  { %s30_s13 = sshll.u32 %s1517_s12, 4  ;;  %s1518_s14 = smov 128   ;;  %s31_s13 = int_to_ptr.vmem [resolvable:$true] %s30_s13 }
   0x8   :  { %s1519_s15 = smov 8  }
   0x9   :  { %36 = dma.hbm_to_vmem [thread:$0]  %s29_s11, 768, %s31_s13, [#allocation5], %s1518_s14, %s1518_s14, %s1519_s15  }
   0xa   :  { %1514 = dma.done.wait [#allocation5], 768  }
   0xb   :  { %1515 = vsyncadd [#allocation5], 4294966528  ;;  %s67_s0 = sld [smem:[#allocation3]]  ;;  %v1574_v0 = vld [vmem:[#allocation4 + $0x28] sm:$0xff]  ;;  %v1576_v1 = vld [vmem:[#allocation4 + $0x20] sm:$0xff]  ;;  %vm76_vm0 = vcmask 1040384  }
   0xc   :  { %s1280_s16 = sld [smem:[#allocation3 + $0x80]]  ;;  %99 = vmatpush.msra.mxu0 %v1574_v0  ;;  %v1582_v2 = vld [vmem:[#allocation4 + $0x18] sm:$0xff]  ;;  %244 = vmatpush.msra.mxu2 %v1574_v0  ;;  %vm78_vm1 = vcmask 1041408   ;;  %v1590_v5 = vld [vmem:[#allocation4 + $0x10] sm:$0xff]  ;;  %v1595_v7 = vld [vmem:[#allocation4 + $0x8] sm:$0xff]  ;;  %vm80_vm2 = vcmask 130048  }
   0xd   :  { %v1600_v9 = vld [vmem:[#allocation4] sm:$0xff]  ;;  %vm85_vm3 = vcmask 392192   ;;  %s1520_s24 = smov 64   ;;  %s1521_s25 = smov 32   ;;  %v1635_v34 = vld [vmem:[%s2024_s4 + $0x38] sm:$0xff]  ;;  %v1640_v35 = vld [vmem:[%s2024_s4 + $0x30] sm:$0xff] }
   0xe   :  { %100 = vmatpush.msra.mxu0 %v1576_v1  ;;  %245 = vmatpush.msra.mxu2 %v1576_v1  ;;  %v1623_v11 = vld [vmem:[%s2023_s3] ss:$0 sm:$0xff]  ;;  %v1647_v36 = vld [vmem:[%s2024_s4 + $0x28] sm:$0xff]  ;;  %v1663_v38 = vld [vmem:[%s2024_s4 + $0x18] sm:$0xff]  ;;  %s1522_s20 = smov 48   ;;  %vm150_vm8 = vcmask 261120  }
   0xf   :  { %167 = vmatpush.msra.mxu1 %v1635_v34  ;;  %311 = vmatpush.msra.mxu3 %v1635_v34  ;;  %v1655_v37 = vld [vmem:[%s2024_s4 + $0x20] sm:$0xff]  ;;  %v1671_v39 = vld [vmem:[%s2024_s4 + $0x10] sm:$0xff]  ;;  %v1681_v40 = vld [vmem:[%s2024_s4 + $0x8] sm:$0xff]  ;;  %vm155_vm9 = vcmask 523264   ;;  %s1292_s10 = sld [smem:[#allocation3 + $0x82]] }
  0x10   :  { %101 = vmatpush.msra.mxu0 %v1582_v2  ;;  %246 = vmatpush.msra.mxu2 %v1582_v2  ;;  %v1699_v43 = vld [vmem:[%s2024_s4] sm:$0xff]  ;;  %s1285_s4 = sld [smem:[#allocation3 + $0x1]] }
  0x11   :  { %s68_s19 = scalar_lea.vmem %s2021_s1, %s67_s0  ;;  %168 = vmatpush.msra.mxu1 %v1640_v35  ;;  %312 = vmatpush.msra.mxu3 %v1640_v35  ;;  %s1673_s0 = sld [smem:[#allocation3 + $0x81]]  ;;  %v1749_v52 = vld [vmem:[%s2025_s5] ss:$0 sm:$0xff] }
  0x12   :  { %s71_s21 = scalar_lea.vmem %s2021_s1, %s1280_s16  ;;  %v69_v3 = vld [vmem:[%s68_s19] sm:$0x1]  ;;  %102 = vmatpush.msra.mxu0 %v1590_v5  ;;  %247 = vmatpush.msra.mxu2 %v1590_v5  ;;  %s1291_s14 = sld [smem:[#allocation3 + $0x2]] }
  0x13   :  { %v1335_v4 = vld [vmem:[%s71_s21] ss:$0 sm:$0xff]  ;;  %169 = vmatpush.msra.mxu1 %v1647_v36  ;;  %313 = vmatpush.msra.mxu3 %v1647_v36  ;;  %s1298_s17 = sld [smem:[#allocation3 + $0x83]] }
  0x14   :  { %v77_v6 = vsel %vm76_vm0, %v69_v3, %v1335_v4  ;;  %103 = vmatpush.msra.mxu0 %v1595_v7  ;;  %248 = vmatpush.msra.mxu2 %v1595_v7  ;;  %s1297_s21 = sld [smem:[#allocation3 + $0x3]] }
  0x15   :  { %v79_v8 = vsel %vm78_vm1, %v77_v6, 0.0  ;;  %170 = vmatpush.msra.mxu1 %v1655_v37  ;;  %314 = vmatpush.msra.mxu3 %v1655_v37  ;;  %s364_s13 = scalar_lea.vmem %s2021_s1, %s1292_s10  ;;  %s1304_s26 = sld [smem:[#allocation3 + $0x84]] }
  0x16   :  { %v81_v10 = vsel %vm80_vm2, %v79_v8, 0.0  ;;  %104 = vmatpush.msra.mxu0 %v1600_v9  ;;  %249 = vmatpush.msra.mxu2 %v1600_v9  ;;  %s217_s27 = scalar_lea.vmem %s2021_s1, %s1285_s4  ;;  %s1303_s30 = sld [smem:[#allocation3 + $0x4]] }
  0x17   :  { %1281 = vmatmul.msk.f32.vlgmr.msra.gmra.mxu0 %vm85_vm3, %v81_v10  ;;  %171 = vmatpush.msra.mxu1 %v1663_v38  ;;  %s220_s2 = scalar_lea.vmem %s2021_s1, %s1673_s0  ;;  %v218_v47 = vld [vmem:[%s217_s27] sm:$0x1]  ;;  %s1310_s12 = sld [smem:[#allocation3 + $0x85]] }
  0x18   :  { %388 = vmatpush.msrb.mxu0 %v1574_v0  ;;  %455 = vmatpush.msrb.mxu2 %v1635_v34  ;;  %v1337_v46 = vld [vmem:[%s220_s2] ss:$0 sm:$0xff]  ;;  %s361_s16 = scalar_lea.vmem %s2021_s1, %s1291_s14  ;;  %s1309_s0 = sld [smem:[#allocation3 + $0x5]] }
  0x19   :  { %315 = vmatpush.msra.mxu3 %v1663_v38  ;;  %172 = vmatpush.msra.mxu1 %v1671_v39  ;;  %v225_v48 = vsel %vm76_vm0, %v218_v47, %v1337_v46  ;;  %s508_s2 = scalar_lea.vmem %s2021_s1, %s1298_s17 }
  0x1a   :  { %389 = vmatpush.msrb.mxu0 %v1576_v1  ;;  %456 = vmatpush.msrb.mxu2 %v1640_v35  ;;  %v226_v49 = vsel %vm78_vm1, %v225_v48, 0.0  ;;  %s505_s23 = scalar_lea.vmem %s2021_s1, %s1297_s21 }
  0x1b   :  { %316 = vmatpush.msra.mxu3 %v1671_v39  ;;  %173 = vmatpush.msra.mxu1 %v1681_v40  ;;  %s652_s29 = scalar_lea.vmem %s2021_s1, %s1304_s26 }
  0x1c   :  { %390 = vmatpush.msrb.mxu0 %v1582_v2  ;;  %457 = vmatpush.msrb.mxu2 %v1647_v36  ;;  %s649_s11 = scalar_lea.vmem %s2021_s1, %s1303_s30 }
  0x1d   :  { %317 = vmatpush.msra.mxu3 %v1681_v40  ;;  %174 = vmatpush.msra.mxu1 %v1699_v43  ;;  %s796_s15 = scalar_lea.vmem %s2021_s1, %s1310_s12 }
  0x1e   :  { %391 = vmatpush.msrb.mxu0 %v1590_v5  ;;  %458 = vmatpush.msrb.mxu2 %v1655_v37  ;;  %s793_s18 = scalar_lea.vmem %s2021_s1, %s1309_s0 }
  0x1f   :  { %318 = vmatpush.msra.mxu3 %v1699_v43  ;;  %532 = vmatpush.msrb.mxu1 %v1574_v0 }
  0x20   :  { %392 = vmatpush.msrb.mxu0 %v1595_v7  ;;  %459 = vmatpush.msrb.mxu2 %v1663_v38 }
  0x21   :  { %599 = vmatpush.msrb.mxu3 %v1635_v34  ;;  %533 = vmatpush.msrb.mxu1 %v1576_v1 }
  0x22   :  { %393 = vmatpush.msrb.mxu0 %v1600_v9  ;;  %460 = vmatpush.msrb.mxu2 %v1671_v39 }
  0x23   :  { %600 = vmatpush.msrb.mxu3 %v1640_v35  ;;  %534 = vmatpush.msrb.mxu1 %v1582_v2 }
  0x24   :  { %676 = vmatpush.msra.mxu0 %v1574_v0  ;;  %461 = vmatpush.msrb.mxu2 %v1681_v40 }
  0x25   :  { %601 = vmatpush.msrb.mxu3 %v1647_v36  ;;  %535 = vmatpush.msrb.mxu1 %v1590_v5 }
  0x26   :  { %677 = vmatpush.msra.mxu0 %v1576_v1  ;;  %462 = vmatpush.msrb.mxu2 %v1699_v43 }
  0x27   :  { %602 = vmatpush.msrb.mxu3 %v1655_v37  ;;  %536 = vmatpush.msrb.mxu1 %v1595_v7 }
  0x28   :  { %678 = vmatpush.msra.mxu0 %v1582_v2 }
  0x29   :  { %603 = vmatpush.msrb.mxu3 %v1663_v38  ;;  %537 = vmatpush.msrb.mxu1 %v1600_v9 }
  0x2a   :  { %679 = vmatpush.msra.mxu0 %v1590_v5 }
  0x2b   :  { %604 = vmatpush.msrb.mxu3 %v1671_v39 }
  0x2c   :  { %680 = vmatpush.msra.mxu0 %v1595_v7 }
  0x2d   :  { %605 = vmatpush.msrb.mxu3 %v1681_v40 }
  0x2e   :  { %681 = vmatpush.msra.mxu0 %v1600_v9 }
  0x2f   :  { %606 = vmatpush.msrb.mxu3 %v1699_v43 }
  0x94   :  { %v106_v12 = vpop.f32.mrf.mxu0 }
  0x95   :  { %v107_v13 = vadd.f32 %v1623_v11, %v106_v12 }
  0x97   :  { %1346 = vtanh.f32 %v107_v13  ;;  %v1282_v15 = vmul.f32 -1.442695, %v107_v13 }
  0x99   :  { %1348 = vpow2.f32 %v1282_v15 }
  0x9d   :  { %v1347_v14 = vpop.eup %1346 }
  0x9e   :  { %131 = vrot.lane.b32.xlu0 %v1347_v14, %s1520_s24 }
  0x9f   :  { %v1349_v16 = vpop.eup %1348 }
  0xa0   :  { %v112_v17 = vadd.f32 1.0, %v1349_v16 }
  0xa2   :  { %1350 = vrcp.f32 %v112_v17  ;;  %v124_v23 = vand.u32 2147483648, %v112_v17  ;;  %vm118_vm5 = vweird.f32 %v112_v17  ;;  %v122_v24 = vand.u32 2147483647, %v112_v17 }
  0xa4   :  { %v125_v26 = vor.u32 1.1754944e-38, %v124_v23  ;;  %vm123_vm7 = vcmp.eq.f32.partialorder %v122_v24, 8.507059e+37 }
  0xa8   :  { %v1351_v18 = vpop.eup %1350 }
  0xa9   :  { %v114_v19 = vmul.f32 %v1351_v18, %v112_v17  ;;  %vm119_vm4 = vweird.f32 %v1351_v18 }
  0xaa   :  { %vm120_vm6 = vmor %vm118_vm5, %vm119_vm4 }
  0xab   :  { %v115_v20 = vsub.f32 1.0, %v114_v19 }
  0xad   :  { %v116_v21 = vmul.f32 %v1351_v18, %v115_v20 }
  0xaf   :  { %v117_v22 = vadd.f32 %v1351_v18, %v116_v21 }
  0xb1   :  { %v121_v25 = vsel %vm120_vm6, %v1351_v18, %v117_v22 }
  0xb2   :  { %v126_v28 = vsel %vm123_vm7, %v125_v26, %v121_v25 }
  0xb3   :  { %v129_v30 = vmul.f32 0.0, %v126_v28 }
 0x110   :  { %v132_v27 = vpop.permute.xlu0 %131 }
 0x111   :  { %v134_v29 = vmul.f32 %v132_v27, %v126_v28 }
 0x113   :  { %136 = vrot.lane.b32.xlu0 %v134_v29, %s1521_s25 }
 0x185   :  { %v137_v31 = vpop.permute.xlu0 %136 }
 0x186   :  { %v1628_v32 = vadd.f32 %v137_v31, %v129_v30 }
 0x188   :  { %1352 = vtanh.f32 %v1628_v32 }
 0x18e   :  { %v1353_v33 = vpop.eup %1352 }
 0x18f   :  { %142 = vrot.lane.b32.xlu1 %v1353_v33, %s1520_s24 }
 0x201   :  { %v143_v41 = vpop.permute.xlu1 %142 }
 0x202   :  { %v145_v42 = vmul.f32 %v143_v41, %v126_v28 }
 0x204   :  { %147 = vrot.lane.b32.xlu2 %v145_v42, %s1521_s25  ;;  %227 = vrot.lane.b32.xlu1 %v145_v42, %s1522_s20 }
 0x25e   :  { %v148_v44 = vpop.permute.xlu2 %147 }
 0x25f   :  { %v151_v45 = vsel %vm150_vm8, %v148_v44, 0.0 }
 0x260   :  { %1283 = vmatmul.msk.f32.vlgmr.msra.gmra.mxu1 %vm155_vm9, %v151_v45 }
 0x261   :  { %743 = vmatpush.msra.mxu1 %v1635_v34 }
 0x263   :  { %744 = vmatpush.msra.mxu1 %v1640_v35 }
 0x265   :  { %745 = vmatpush.msra.mxu1 %v1647_v36 }
 0x267   :  { %746 = vmatpush.msra.mxu1 %v1655_v37 }
 0x269   :  { %747 = vmatpush.msra.mxu1 %v1663_v38 }
 0x26b   :  { %748 = vmatpush.msra.mxu1 %v1671_v39 }
 0x26d   :  { %749 = vmatpush.msra.mxu1 %v1681_v40 }
 0x26f   :  { %750 = vmatpush.msra.mxu1 %v1699_v43 }
 0x276   :  { %v228_v50 = vpop.permute.xlu1 %227 }
 0x277   :  { %v230_v51 = vsel %vm80_vm2, %v226_v49, %v228_v50 }
 0x278   :  { %1287 = vmatmul.msk.f32.vlgmr.msra.gmra.mxu2 %vm85_vm3, %v230_v51 }
 0x279   :  { %820 = vmatpush.msra.mxu2 %v1574_v0 }
 0x27b   :  { %821 = vmatpush.msra.mxu2 %v1576_v1 }
 0x27d   :  { %822 = vmatpush.msra.mxu2 %v1582_v2 }
 0x27f   :  { %823 = vmatpush.msra.mxu2 %v1590_v5 }
 0x281   :  { %824 = vmatpush.msra.mxu2 %v1595_v7 }
 0x283   :  { %825 = vmatpush.msra.mxu2 %v1600_v9 }
 0x2dd   :  { %v176_v53 = vpop.f32.mrf.mxu1 }
 0x2de   :  { %v177_v54 = vadd.f32 %v1749_v52, %v176_v53 }
 0x2e0   :  { %1354 = vtanh.f32 %v177_v54  ;;  %v1284_v59 = vmul.f32 -1.442695, %v177_v54 }
 0x2e6   :  { %v1355_v55 = vpop.eup %1354 }
 0x2e7   :  { %201 = vrot.lane.b32.xlu2 %v1355_v55, %s1520_s24 }
 0x2fb   :  { %v251_v56 = vpop.f32.mrf.mxu2 }
 0x2fc   :  { %v252_v57 = vadd.f32 %v1623_v11, %v251_v56  ;;  %v1339_v56 = vld [vmem:[%s364_s13] ss:$0 sm:$0xff] }
 0x2fe   :  { %1356 = vtanh.f32 %v252_v57  ;;  %v1288_v17 = vmul.f32 -1.442695, %v252_v57  ;;  %v362_v57 = vld [vmem:[%s361_s16] sm:$0x1] }
 0x2ff   :  { %1358 = vpow2.f32 %v1284_v59 }
 0x304   :  { %v1357_v58 = vpop.eup %1356 }
 0x305   :  { %276 = vrot.lane.b32.xlu0 %v1357_v58, %s1520_s24  ;;  %v1359_v60 = vpop.eup %1358  ;;  %v369_v58 = vsel %vm76_vm0, %v362_v57, %v1339_v56 }
 0x306   :  { %v182_v61 = vadd.f32 1.0, %v1359_v60  ;;  %v370_v59 = vsel %vm78_vm1, %v369_v58, 0.0 }
 0x308   :  { %1360 = vrcp.f32 %v182_v61  ;;  %v194_v8 = vand.u32 2147483648, %v182_v61  ;;  %vm188_vm11 = vweird.f32 %v182_v61  ;;  %v192_v10 = vand.u32 2147483647, %v182_v61 }
 0x309   :  { %1362 = vpow2.f32 %v1288_v17 }
 0x30a   :  { %v195_v13 = vor.u32 1.1754944e-38, %v194_v8  ;;  %vm193_vm13 = vcmp.eq.f32.partialorder %v192_v10, 8.507059e+37 }
 0x30e   :  { %v1361_v62 = vpop.eup %1360 }
 0x30f   :  { %v184_v63 = vmul.f32 %v1361_v62, %v182_v61  ;;  %vm189_vm10 = vweird.f32 %v1361_v62  ;;  %v1363_v18 = vpop.eup %1362 }
 0x310   :  { %vm190_vm12 = vmor %vm188_vm11, %vm189_vm10  ;;  %v257_v19 = vadd.f32 1.0, %v1363_v18 }
 0x311   :  { %v185_v3 = vsub.f32 1.0, %v184_v63 }
 0x312   :  { %1364 = vrcp.f32 %v257_v19  ;;  %v269_v25 = vand.u32 2147483648, %v257_v19  ;;  %vm263_vm15 = vweird.f32 %v257_v19  ;;  %v267_v26 = vand.u32 2147483647, %v257_v19 }
 0x313   :  { %v186_v4 = vmul.f32 %v1361_v62, %v185_v3 }
 0x314   :  { %v270_v28 = vor.u32 1.1754944e-38, %v269_v25  ;;  %vm268_vm5 = vcmp.eq.f32.partialorder %v267_v26, 8.507059e+37 }
 0x315   :  { %v187_v6 = vadd.f32 %v1361_v62, %v186_v4 }
 0x317   :  { %v191_v12 = vsel %vm190_vm12, %v1361_v62, %v187_v6 }
 0x318   :  { %v196_v15 = vsel %vm193_vm13, %v195_v13, %v191_v12  ;;  %v1365_v20 = vpop.eup %1364 }
 0x319   :  { %v259_v21 = vmul.f32 %v1365_v20, %v257_v19  ;;  %vm264_vm14 = vweird.f32 %v1365_v20  ;;  %v199_v33 = vmul.f32 0.0, %v196_v15 }
 0x31a   :  { %vm265_vm4 = vmor %vm263_vm15, %vm264_vm14 }
 0x31b   :  { %v260_v22 = vsub.f32 1.0, %v259_v21 }
 0x31d   :  { %v261_v23 = vmul.f32 %v1365_v20, %v260_v22 }
 0x31f   :  { %v262_v24 = vadd.f32 %v1365_v20, %v261_v23 }
 0x321   :  { %v266_v27 = vsel %vm265_vm4, %v1365_v20, %v262_v24 }
 0x322   :  { %v271_v30 = vsel %vm268_vm5, %v270_v28, %v266_v27 }
 0x323   :  { %v274_v45 = vmul.f32 %v271_v30, %v1628_v32 }
 0x341   :  { %v202_v14 = vpop.permute.xlu2 %201 }
 0x342   :  { %v204_v16 = vmul.f32 %v202_v14, %v196_v15 }
 0x344   :  { %206 = vrot.lane.b32.xlu1 %v204_v16, %s1521_s25 }
 0x377   :  { %v277_v29 = vpop.permute.xlu0 %276 }
 0x378   :  { %v279_v31 = vmul.f32 %v277_v29, %v271_v30 }
 0x37a   :  { %281 = vrot.lane.b32.xlu2 %v279_v31, %s1521_s25 }
 0x3b6   :  { %v207_v41 = vpop.permute.xlu1 %206 }
 0x3b7   :  { %v1757_v42 = vadd.f32 %v207_v41, %v199_v33 }
 0x3b9   :  { %1366 = vtanh.f32 %v1757_v42 }
 0x3bf   :  { %v1367_v44 = vpop.eup %1366 }
 0x3c0   :  { %212 = vrot.lane.b32.xlu0 %v1367_v44, %s1520_s24 }
 0x3d4   :  { %v282_v46 = vpop.permute.xlu2 %281 }
 0x3d5   :  { %v1762_v47 = vadd.f32 %v282_v46, %v274_v45 }
 0x3d7   :  { %1368 = vtanh.f32 %v1762_v47 }
 0x3dd   :  { %v1369_v48 = vpop.eup %1368 }
 0x3de   :  { %287 = vrot.lane.b32.xlu1 %v1369_v48, %s1520_s24 }
 0x432   :  { %v213_v49 = vpop.permute.xlu0 %212 }
 0x433   :  { %v215_v50 = vmul.f32 %v213_v49, %v196_v15 }
 0x435   :  { %296 = vrot.lane.b32.xlu0 %v215_v50, %s1520_s24 }
 0x450   :  { %v288_v51 = vpop.permute.xlu1 %287 }
 0x451   :  { %v290_v53 = vmul.f32 %v288_v51, %v271_v30 }
 0x453   :  { %371 = vrot.lane.b32.xlu1 %v290_v53, %s1522_s20  ;;  %292 = vrot.lane.b32.xlu2 %v290_v53, %s1521_s25 }
 0x4a7   :  { %v297_v32 = vpop.permute.xlu0 %296 }
 0x4ad   :  { %v293_v54 = vpop.permute.xlu2 %292 }
 0x4ae   :  { %v299_v55 = vsel %vm150_vm8, %v293_v54, %v297_v32 }
 0x4af   :  { %1289 = vmatmul.msk.f32.vlgmr.msra.gmra.mxu3 %vm155_vm9, %v299_v55 }
 0x4b0   :  { %887 = vmatpush.msra.mxu3 %v1635_v34 }
 0x4b2   :  { %888 = vmatpush.msra.mxu3 %v1640_v35 }
 0x4b4   :  { %889 = vmatpush.msra.mxu3 %v1647_v36 }
 0x4b6   :  { %890 = vmatpush.msra.mxu3 %v1655_v37 }
 0x4b8   :  { %891 = vmatpush.msra.mxu3 %v1663_v38 }
 0x4ba   :  { %892 = vmatpush.msra.mxu3 %v1671_v39 }
 0x4bc   :  { %893 = vmatpush.msra.mxu3 %v1681_v40 }
 0x4be   :  { %894 = vmatpush.msra.mxu3 %v1699_v43 }
 0x4c5   :  { %v372_v60 = vpop.permute.xlu1 %371 }
 0x4c6   :  { %v374_v61 = vsel %vm80_vm2, %v370_v59, %v372_v60 }
 0x4c7   :  { %1293 = vmatmul.msk.f32.vlgmr.msrb.gmra.mxu0 %vm85_vm3, %v374_v61 }
 0x4c8   :  { %964 = vmatpush.msrb.mxu0 %v1574_v0 }
 0x4ca   :  { %965 = vmatpush.msrb.mxu0 %v1576_v1 }
 0x4cc   :  { %966 = vmatpush.msrb.mxu0 %v1582_v2 }
 0x4ce   :  { %967 = vmatpush.msrb.mxu0 %v1590_v5 }
 0x4d0   :  { %968 = vmatpush.msrb.mxu0 %v1595_v7 }
 0x4d2   :  { %969 = vmatpush.msrb.mxu0 %v1600_v9 }
 0x532   :  { %v320_v62 = vpop.f32.mrf.mxu3 }
 0x533   :  { %v321_v63 = vadd.f32 %v1749_v52, %v320_v62 }
 0x535   :  { %1370 = vtanh.f32 %v321_v63  ;;  %v1290_v10 = vmul.f32 -1.442695, %v321_v63 }
 0x53b   :  { %v1371_v3 = vpop.eup %1370 }
 0x53c   :  { %345 = vrot.lane.b32.xlu2 %v1371_v3, %s1520_s24 }
 0x544   :  { %v395_v4 = vpop.f32.mrf.mxu0 }
 0x545   :  { %v396_v6 = vadd.f32 %v1623_v11, %v395_v4  ;;  %v1340_v4 = vld [vmem:[%s508_s2] ss:$0 sm:$0xff] }
 0x547   :  { %1372 = vtanh.f32 %v396_v6  ;;  %v1294_v21 = vmul.f32 -1.442695, %v396_v6  ;;  %v506_v6 = vld [vmem:[%s505_s23] sm:$0x1]  ;;  %s1315_s23 = sld [smem:[#allocation3 + $0x6]] }
 0x548   :  { %1374 = vpow2.f32 %v1290_v10 }
 0x54d   :  { %v1373_v8 = vpop.eup %1372  ;;  %s937_s28 = scalar_lea.vmem %s2021_s1, %s1315_s23 }
 0x54e   :  { %420 = vrot.lane.b32.xlu0 %v1373_v8, %s1520_s24  ;;  %v1375_v12 = vpop.eup %1374  ;;  %v513_v8 = vsel %vm76_vm0, %v506_v6, %v1340_v4 }
 0x54f   :  { %v326_v13 = vadd.f32 1.0, %v1375_v12  ;;  %v514_v10 = vsel %vm78_vm1, %v513_v8, 0.0 }
 0x551   :  { %1376 = vrcp.f32 %v326_v13  ;;  %v338_v19 = vand.u32 2147483648, %v326_v13  ;;  %vm332_vm7 = vweird.f32 %v326_v13  ;;  %v336_v20 = vand.u32 2147483647, %v326_v13 }
 0x552   :  { %1378 = vpow2.f32 %v1294_v21 }
 0x553   :  { %v339_v23 = vor.u32 1.1754944e-38, %v338_v19  ;;  %vm337_vm11 = vcmp.eq.f32.partialorder %v336_v20, 8.507059e+37 }
 0x557   :  { %v1377_v14 = vpop.eup %1376 }
 0x558   :  { %v328_v15 = vmul.f32 %v1377_v14, %v326_v13  ;;  %vm333_vm6 = vweird.f32 %v1377_v14  ;;  %v1379_v27 = vpop.eup %1378 }
 0x559   :  { %vm334_vm10 = vmor %vm332_vm7, %vm333_vm6  ;;  %v401_v28 = vadd.f32 1.0, %v1379_v27 }
 0x55a   :  { %v329_v16 = vsub.f32 1.0, %v328_v15 }
 0x55b   :  { %1380 = vrcp.f32 %v401_v28  ;;  %v413_v44 = vand.u32 2147483648, %v401_v28  ;;  %vm407_vm13 = vweird.f32 %v401_v28  ;;  %v411_v45 = vand.u32 2147483647, %v401_v28 }
 0x55c   :  { %v330_v17 = vmul.f32 %v1377_v14, %v329_v16 }
 0x55d   :  { %v414_v48 = vor.u32 1.1754944e-38, %v413_v44  ;;  %vm412_vm15 = vcmp.eq.f32.partialorder %v411_v45, 8.507059e+37 }
 0x55e   :  { %v331_v18 = vadd.f32 %v1377_v14, %v330_v17 }
 0x560   :  { %v335_v22 = vsel %vm334_vm10, %v1377_v14, %v331_v18 }
 0x561   :  { %v340_v25 = vsel %vm337_vm11, %v339_v23, %v335_v22  ;;  %v1381_v29 = vpop.eup %1380 }
 0x562   :  { %v403_v30 = vmul.f32 %v1381_v29, %v401_v28  ;;  %vm408_vm12 = vweird.f32 %v1381_v29  ;;  %v343_v53 = vmul.f32 %v340_v25, %v1757_v42 }
 0x563   :  { %vm409_vm14 = vmor %vm407_vm13, %vm408_vm12 }
 0x564   :  { %v404_v31 = vsub.f32 1.0, %v403_v30 }
 0x566   :  { %v405_v33 = vmul.f32 %v1381_v29, %v404_v31 }
 0x568   :  { %v406_v41 = vadd.f32 %v1381_v29, %v405_v33 }
 0x56a   :  { %v410_v46 = vsel %vm409_vm14, %v1381_v29, %v406_v41 }
 0x56b   :  { %v415_v50 = vsel %vm412_vm15, %v414_v48, %v410_v46 }
 0x56c   :  { %v418_v56 = vmul.f32 %v415_v50, %v1762_v47 }
 0x596   :  { %v346_v24 = vpop.permute.xlu2 %345 }
 0x597   :  { %v348_v26 = vmul.f32 %v346_v24, %v340_v25 }
 0x599   :  { %350 = vrot.lane.b32.xlu1 %v348_v26, %s1521_s25 }
 0x5c0   :  { %v421_v49 = vpop.permute.xlu0 %420 }
 0x5c1   :  { %v423_v51 = vmul.f32 %v421_v49, %v415_v50 }
 0x5c3   :  { %425 = vrot.lane.b32.xlu2 %v423_v51, %s1521_s25 }
 0x60b   :  { %v351_v32 = vpop.permute.xlu1 %350 }
 0x60c   :  { %v1802_v54 = vadd.f32 %v351_v32, %v343_v53 }
 0x60e   :  { %1382 = vtanh.f32 %v1802_v54 }
 0x614   :  { %v1383_v55 = vpop.eup %1382 }
 0x615   :  { %356 = vrot.lane.b32.xlu0 %v1383_v55, %s1520_s24 }
 0x61d   :  { %v426_v57 = vpop.permute.xlu2 %425 }
 0x61e   :  { %v1807_v58 = vadd.f32 %v426_v57, %v418_v56 }
 0x620   :  { %1384 = vtanh.f32 %v1807_v58 }
 0x626   :  { %v1385_v59 = vpop.eup %1384 }
 0x627   :  { %431 = vrot.lane.b32.xlu1 %v1385_v59, %s1520_s24 }
 0x687   :  { %v357_v42 = vpop.permute.xlu0 %356 }
 0x688   :  { %v359_v60 = vmul.f32 %v357_v42, %v340_v25 }
 0x68a   :  { %440 = vrot.lane.b32.xlu0 %v359_v60, %s1520_s24 }
 0x699   :  { %v432_v61 = vpop.permute.xlu1 %431 }
 0x69a   :  { %v434_v62 = vmul.f32 %v432_v61, %v415_v50 }
 0x69c   :  { %515 = vrot.lane.b32.xlu1 %v434_v62, %s1522_s20  ;;  %436 = vrot.lane.b32.xlu2 %v434_v62, %s1521_s25 }
 0x6f6   :  { %v437_v47 = vpop.permute.xlu2 %436 }
 0x6fc   :  { %v441_v63 = vpop.permute.xlu0 %440 }
 0x6fd   :  { %v443_v3 = vsel %vm150_vm8, %v437_v47, %v441_v63 }
 0x6fe   :  { %1295 = vmatmul.msk.f32.vlgmr.msrb.gmra.mxu2 %vm155_vm9, %v443_v3 }
 0x6ff   :  { %1031 = vmatpush.msrb.mxu2 %v1635_v34 }
 0x701   :  { %1032 = vmatpush.msrb.mxu2 %v1640_v35 }
 0x703   :  { %1033 = vmatpush.msrb.mxu2 %v1647_v36 }
 0x705   :  { %1034 = vmatpush.msrb.mxu2 %v1655_v37 }
 0x707   :  { %1035 = vmatpush.msrb.mxu2 %v1663_v38 }
 0x709   :  { %1036 = vmatpush.msrb.mxu2 %v1671_v39 }
 0x70b   :  { %1037 = vmatpush.msrb.mxu2 %v1681_v40 }
 0x70d   :  { %1038 = vmatpush.msrb.mxu2 %v1699_v43 }
 0x70e   :  { %v516_v12 = vpop.permute.xlu1 %515 }
 0x70f   :  { %v518_v13 = vsel %vm80_vm2, %v514_v10, %v516_v12  ;;  %v1341_v10 = vld [vmem:[%s652_s29] ss:$0 sm:$0xff]  ;;  %s1322_s29 = sld [smem:[#allocation3 + $0x87]] }
 0x710   :  { %1299 = vmatmul.msk.f32.vlgmr.msrb.gmra.mxu1 %vm85_vm3, %v518_v13  ;;  %v650_v12 = vld [vmem:[%s649_s11] sm:$0x1]  ;;  %s1321_s11 = sld [smem:[#allocation3 + $0x7]] }
 0x711   :  { %1108 = vmatpush.msrb.mxu1 %v1574_v0  ;;  %v657_v13 = vsel %vm76_vm0, %v650_v12, %v1341_v10  ;;  %v1913_v12 = vld [vmem:[%s2023_s3] ss:$0 sm:$0xff]  ;;  %s1316_s3 = sld [smem:[#allocation3 + $0x86]] }
 0x713   :  { %1109 = vmatpush.msrb.mxu1 %v1576_v1 }
 0x715   :  { %1110 = vmatpush.msrb.mxu1 %v1582_v2  ;;  %s1084_s10 = scalar_lea.vmem %s2021_s1, %s1322_s29 }
 0x716   :  { %s1081_s14 = scalar_lea.vmem %s2021_s1, %s1321_s11 }
 0x717   :  { %1111 = vmatpush.msrb.mxu1 %v1590_v5  ;;  %s940_s4 = scalar_lea.vmem %s2021_s1, %s1316_s3 }
 0x719   :  { %1112 = vmatpush.msrb.mxu1 %v1595_v7 }
 0x71b   :  { %1113 = vmatpush.msrb.mxu1 %v1600_v9 }
 0x781   :  { %v464_v14 = vpop.f32.mrf.mxu2 }
 0x782   :  { %v465_v15 = vadd.f32 %v1749_v52, %v464_v14  ;;  %v658_v14 = vsel %vm78_vm1, %v657_v13, 0.0 }
 0x784   :  { %1386 = vtanh.f32 %v465_v15  ;;  %v1296_v2 = vmul.f32 -1.442695, %v465_v15 }
 0x78a   :  { %v1387_v16 = vpop.eup %1386 }
 0x78b   :  { %489 = vrot.lane.b32.xlu2 %v1387_v16, %s1520_s24 }
 0x78d   :  { %v539_v17 = vpop.f32.mrf.mxu1 }
 0x78e   :  { %v540_v0 = vadd.f32 %v1623_v11, %v539_v17 }
 0x790   :  { %1388 = vtanh.f32 %v540_v0  ;;  %v1300_v21 = vmul.f32 -1.442695, %v540_v0 }
 0x791   :  { %1390 = vpow2.f32 %v1296_v2 }
 0x796   :  { %v1389_v1 = vpop.eup %1388 }
 0x797   :  { %564 = vrot.lane.b32.xlu0 %v1389_v1, %s1520_s24  ;;  %v1391_v5 = vpop.eup %1390 }
 0x798   :  { %v470_v7 = vadd.f32 1.0, %v1391_v5 }
 0x79a   :  { %1392 = vrcp.f32 %v470_v7  ;;  %v482_v23 = vand.u32 2147483648, %v470_v7  ;;  %vm476_vm5 = vweird.f32 %v470_v7  ;;  %v480_v24 = vand.u32 2147483647, %v470_v7 }
 0x79b   :  { %1394 = vpow2.f32 %v1300_v21 }
 0x79c   :  { %v483_v26 = vor.u32 1.1754944e-38, %v482_v23  ;;  %vm481_vm7 = vcmp.eq.f32.partialorder %v480_v24, 8.507059e+37 }
 0x7a0   :  { %v1393_v9 = vpop.eup %1392 }
 0x7a1   :  { %v472_v18 = vmul.f32 %v1393_v9, %v470_v7  ;;  %vm477_vm4 = vweird.f32 %v1393_v9  ;;  %v1395_v29 = vpop.eup %1394 }
 0x7a2   :  { %vm478_vm6 = vmor %vm476_vm5, %vm477_vm4  ;;  %v545_v31 = vadd.f32 1.0, %v1395_v29 }
 0x7a3   :  { %v473_v19 = vsub.f32 1.0, %v472_v18 }
 0x7a4   :  { %1396 = vrcp.f32 %v545_v31  ;;  %v557_v48 = vand.u32 2147483648, %v545_v31  ;;  %vm551_vm11 = vweird.f32 %v545_v31  ;;  %v555_v49 = vand.u32 2147483647, %v545_v31 }
 0x7a5   :  { %v474_v20 = vmul.f32 %v1393_v9, %v473_v19 }
 0x7a6   :  { %v558_v51 = vor.u32 1.1754944e-38, %v557_v48  ;;  %vm556_vm13 = vcmp.eq.f32.partialorder %v555_v49, 8.507059e+37 }
 0x7a7   :  { %v475_v22 = vadd.f32 %v1393_v9, %v474_v20 }
 0x7a9   :  { %v479_v25 = vsel %vm478_vm6, %v1393_v9, %v475_v22 }
 0x7aa   :  { %v484_v28 = vsel %vm481_vm7, %v483_v26, %v479_v25  ;;  %v1397_v33 = vpop.eup %1396 }
 0x7ab   :  { %v547_v41 = vmul.f32 %v1397_v33, %v545_v31  ;;  %vm552_vm10 = vweird.f32 %v1397_v33  ;;  %v487_v56 = vmul.f32 %v484_v28, %v1802_v54 }
 0x7ac   :  { %vm553_vm12 = vmor %vm551_vm11, %vm552_vm10 }
 0x7ad   :  { %v548_v44 = vsub.f32 1.0, %v547_v41 }
 0x7af   :  { %v549_v45 = vmul.f32 %v1397_v33, %v548_v44 }
 0x7b1   :  { %v550_v46 = vadd.f32 %v1397_v33, %v549_v45 }
 0x7b3   :  { %v554_v50 = vsel %vm553_vm12, %v1397_v33, %v550_v46 }
 0x7b4   :  { %v559_v53 = vsel %vm556_vm13, %v558_v51, %v554_v50 }
 0x7b5   :  { %v562_v60 = vmul.f32 %v559_v53, %v1807_v58 }
 0x7e5   :  { %v490_v27 = vpop.permute.xlu2 %489 }
 0x7e6   :  { %v492_v30 = vmul.f32 %v490_v27, %v484_v28 }
 0x7e8   :  { %494 = vrot.lane.b32.xlu1 %v492_v30, %s1521_s25 }
 0x809   :  { %v565_v32 = vpop.permute.xlu0 %564 }
 0x80a   :  { %v567_v55 = vmul.f32 %v565_v32, %v559_v53 }
 0x80c   :  { %569 = vrot.lane.b32.xlu2 %v567_v55, %s1521_s25 }
 0x85a   :  { %v495_v57 = vpop.permute.xlu1 %494 }
 0x85b   :  { %v1847_v59 = vadd.f32 %v495_v57, %v487_v56 }
 0x85d   :  { %1398 = vtanh.f32 %v1847_v59 }
 0x863   :  { %v1399_v42 = vpop.eup %1398 }
 0x864   :  { %500 = vrot.lane.b32.xlu0 %v1399_v42, %s1520_s24 }
 0x866   :  { %v570_v61 = vpop.permute.xlu2 %569 }
 0x867   :  { %v1852_v62 = vadd.f32 %v570_v61, %v562_v60 }
 0x869   :  { %1400 = vtanh.f32 %v1852_v62 }
 0x86f   :  { %v1401_v47 = vpop.eup %1400 }
 0x870   :  { %575 = vrot.lane.b32.xlu1 %v1401_v47, %s1520_s24  ;;  %v794_v47 = vld [vmem:[%s793_s18] sm:$0x1] }
 0x8d6   :  { %v501_v54 = vpop.permute.xlu0 %500 }
 0x8d7   :  { %v503_v63 = vmul.f32 %v501_v54, %v484_v28 }
 0x8d9   :  { %584 = vrot.lane.b32.xlu0 %v503_v63, %s1520_s24 }
 0x8e2   :  { %v576_v3 = vpop.permute.xlu1 %575 }
 0x8e3   :  { %v578_v4 = vmul.f32 %v576_v3, %v559_v53 }
 0x8e5   :  { %659 = vrot.lane.b32.xlu1 %v578_v4, %s1522_s20  ;;  %580 = vrot.lane.b32.xlu2 %v578_v4, %s1521_s25 }
 0x93f   :  { %v581_v58 = vpop.permute.xlu2 %580 }
 0x94b   :  { %v585_v6 = vpop.permute.xlu0 %584 }
 0x94c   :  { %v587_v8 = vsel %vm150_vm8, %v581_v58, %v585_v6 }
 0x94d   :  { %1301 = vmatmul.msk.f32.vlgmr.msrb.gmra.mxu3 %vm155_vm9, %v587_v8 }
 0x957   :  { %v660_v15 = vpop.permute.xlu1 %659 }
 0x958   :  { %v662_v16 = vsel %vm80_vm2, %v658_v14, %v660_v15 }
 0x959   :  { %1305 = vmatmul.msk.f32.vlgmr.msra.gmra.mxu0 %vm85_vm3, %v662_v16 }
 0x95a   :  { %1175 = vmatpush.msra.mxu0 %v1635_v34 }
 0x95c   :  { %1176 = vmatpush.msra.mxu0 %v1640_v35 }
 0x95e   :  { %1177 = vmatpush.msra.mxu0 %v1647_v36 }
 0x960   :  { %1178 = vmatpush.msra.mxu0 %v1655_v37 }
 0x962   :  { %1179 = vmatpush.msra.mxu0 %v1663_v38 }
 0x964   :  { %1180 = vmatpush.msra.mxu0 %v1671_v39 }
 0x966   :  { %1181 = vmatpush.msra.mxu0 %v1681_v40 }
 0x968   :  { %1182 = vmatpush.msra.mxu0 %v1699_v43 }
 0x9d0   :  { %v608_v17 = vpop.f32.mrf.mxu3 }
 0x9d1   :  { %v609_v0 = vadd.f32 %v1749_v52, %v608_v17 }
 0x9d3   :  { %1402 = vtanh.f32 %v609_v0  ;;  %v1302_v40 = vmul.f32 -1.442695, %v609_v0 }
 0x9d6   :  { %v683_v1 = vpop.f32.mrf.mxu0 }
 0x9d7   :  { %v684_v34 = vadd.f32 %v1623_v11, %v683_v1 }
 0x9d9   :  { %v1403_v35 = vpop.eup %1402  ;;  %1404 = vtanh.f32 %v684_v34  ;;  %v1306_v37 = vmul.f32 -1.442695, %v684_v34 }
 0x9da   :  { %633 = vrot.lane.b32.xlu0 %v1403_v35, %s1520_s24 }
 0x9db   :  { %1406 = vpow2.f32 %v1306_v37 }
 0x9df   :  { %v1405_v36 = vpop.eup %1404 }
 0x9e0   :  { %708 = vrot.lane.b32.xlu2 %v1405_v36, %s1520_s24 }
 0x9e1   :  { %v1407_v38 = vpop.eup %1406 }
 0x9e2   :  { %v689_v39 = vadd.f32 1.0, %v1407_v38 }
 0x9e4   :  { %1408 = vrcp.f32 %v689_v39  ;;  %v701_v19 = vand.u32 2147483648, %v689_v39  ;;  %vm695_vm15 = vweird.f32 %v689_v39  ;;  %v699_v20 = vand.u32 2147483647, %v689_v39 }
 0x9e5   :  { %1410 = vpow2.f32 %v1302_v40 }
 0x9e6   :  { %v702_v23 = vor.u32 1.1754944e-38, %v701_v19  ;;  %vm700_vm5 = vcmp.eq.f32.partialorder %v699_v20, 8.507059e+37 }
 0x9ea   :  { %v1409_v43 = vpop.eup %1408 }
 0x9eb   :  { %v691_v2 = vmul.f32 %v1409_v43, %v689_v39  ;;  %v1411_v5 = vpop.eup %1410  ;;  %vm696_vm14 = vweird.f32 %v1409_v43 }
 0x9ec   :  { %v614_v9 = vadd.f32 1.0, %v1411_v5  ;;  %vm697_vm4 = vmor %vm695_vm15, %vm696_vm14 }
 0x9ed   :  { %v692_v7 = vsub.f32 1.0, %v691_v2 }
 0x9ee   :  { %1412 = vrcp.f32 %v614_v9  ;;  %v626_v31 = vand.u32 2147483648, %v614_v9  ;;  %vm620_vm7 = vweird.f32 %v614_v9  ;;  %v624_v33 = vand.u32 2147483647, %v614_v9 }
 0x9ef   :  { %v693_v11 = vmul.f32 %v1409_v43, %v692_v7 }
 0x9f0   :  { %v627_v44 = vor.u32 1.1754944e-38, %v626_v31  ;;  %vm625_vm11 = vcmp.eq.f32.partialorder %v624_v33, 8.507059e+37 }
 0x9f1   :  { %v694_v18 = vadd.f32 %v1409_v43, %v693_v11 }
 0x9f3   :  { %v698_v22 = vsel %vm697_vm4, %v1409_v43, %v694_v18 }
 0x9f4   :  { %v1413_v21 = vpop.eup %1412  ;;  %v703_v25 = vsel %vm700_vm5, %v702_v23, %v698_v22 }
 0x9f5   :  { %v616_v24 = vmul.f32 %v1413_v21, %v614_v9  ;;  %vm621_vm6 = vweird.f32 %v1413_v21  ;;  %v706_v53 = vmul.f32 %v703_v25, %v1852_v62  ;;  %v1342_v62 = vld [vmem:[%s796_s15] ss:$0 sm:$0xff] }
 0x9f6   :  { %vm622_vm10 = vmor %vm620_vm7, %vm621_vm6  ;;  %v801_v54 = vsel %vm76_vm0, %v794_v47, %v1342_v62 }
 0x9f7   :  { %v617_v28 = vsub.f32 1.0, %v616_v24  ;;  %v802_v63 = vsel %vm78_vm1, %v801_v54, 0.0 }
 0x9f9   :  { %v618_v29 = vmul.f32 %v1413_v21, %v617_v28 }
 0x9fb   :  { %v619_v30 = vadd.f32 %v1413_v21, %v618_v29 }
 0x9fd   :  { %v623_v41 = vsel %vm622_vm10, %v1413_v21, %v619_v30 }
 0x9fe   :  { %v628_v46 = vsel %vm625_vm11, %v627_v44, %v623_v41 }
 0x9ff   :  { %v631_v49 = vmul.f32 %v628_v46, %v1847_v59 }
 0xa3a   :  { %v709_v26 = vpop.permute.xlu2 %708 }
 0xa3b   :  { %v711_v27 = vmul.f32 %v709_v26, %v703_v25 }
 0xa3d   :  { %713 = vrot.lane.b32.xlu1 %v711_v27, %s1521_s25 }
 0xa4c   :  { %v634_v45 = vpop.permute.xlu0 %633 }
 0xa4d   :  { %v636_v48 = vmul.f32 %v634_v45, %v628_v46 }
 0xa4f   :  { %638 = vrot.lane.b32.xlu2 %v636_v48, %s1521_s25 }
 0xaa9   :  { %v639_v50 = vpop.permute.xlu2 %638 }
 0xaaa   :  { %v1886_v51 = vadd.f32 %v639_v50, %v631_v49 }
 0xaac   :  { %1414 = vtanh.f32 %v1886_v51 }
 0xaaf   :  { %v714_v32 = vpop.permute.xlu1 %713 }
 0xab0   :  { %v1890_v55 = vadd.f32 %v714_v32, %v706_v53 }
 0xab2   :  { %v1415_v56 = vpop.eup %1414  ;;  %1416 = vtanh.f32 %v1890_v55 }
 0xab3   :  { %644 = vrot.lane.b32.xlu1 %v1415_v56, %s1520_s24 }
 0xab8   :  { %v1417_v57 = vpop.eup %1416 }
 0xab9   :  { %719 = vrot.lane.b32.xlu0 %v1417_v57, %s1520_s24  ;;  %v1343_v57 = vld [vmem:[%s940_s4] ss:$0 sm:$0xff] }
 0xb25   :  { %v645_v59 = vpop.permute.xlu1 %644 }
 0xb26   :  { %v647_v42 = vmul.f32 %v645_v59, %v628_v46  ;;  %v938_v59 = vld [vmem:[%s937_s28] sm:$0x1] }
 0xb28   :  { %728 = vrot.lane.b32.xlu1 %v647_v42, %s1520_s24  ;;  %v945_v42 = vsel %vm76_vm0, %v938_v59, %v1343_v57 }
 0xb2b   :  { %v720_v60 = vpop.permute.xlu0 %719 }
 0xb2c   :  { %v722_v61 = vmul.f32 %v720_v60, %v703_v25  ;;  %v946_v60 = vsel %vm78_vm1, %v945_v42, 0.0 }
 0xb2e   :  { %724 = vrot.lane.b32.xlu0 %v722_v61, %s1521_s25  ;;  %803 = vrot.lane.b32.xlu2 %v722_v61, %s1522_s20 }
 0xb88   :  { %v804_v3 = vpop.permute.xlu2 %803 }
 0xb89   :  { %v806_v4 = vsel %vm80_vm2, %v802_v63, %v804_v3 }
 0xb8a   :  { %1311 = vmatmul.msk.f32.vlgmr.msra.gmra.mxu2 %vm85_vm3, %v806_v4 }
 0xb9a   :  { %v729_v58 = vpop.permute.xlu1 %728 }
 0xba0   :  { %v725_v6 = vpop.permute.xlu0 %724 }
 0xba1   :  { %v731_v8 = vsel %vm150_vm8, %v725_v6, %v729_v58 }
 0xba2   :  { %1307 = vmatmul.msk.f32.vlgmr.msra.gmra.mxu1 %vm155_vm9, %v731_v8 }
 0xc0d   :  { %v827_v10 = vpop.f32.mrf.mxu2 }
 0xc0e   :  { %v828_v13 = vadd.f32 %v1913_v12, %v827_v10 }
 0xc10   :  { %1418 = vtanh.f32 %v828_v13  ;;  %v1312_v1 = vmul.f32 -1.442695, %v828_v13 }
 0xc16   :  { %v1419_v14 = vpop.eup %1418 }
 0xc17   :  { %852 = vrot.lane.b32.xlu0 %v1419_v14, %s1520_s24 }
 0xc1f   :  { %v752_v15 = vpop.f32.mrf.mxu1 }
 0xc20   :  { %v753_v16 = vadd.f32 %v1749_v52, %v752_v15 }
 0xc22   :  { %1420 = vtanh.f32 %v753_v16  ;;  %v1308_v0 = vmul.f32 -1.442695, %v753_v16 }
 0xc24   :  { %1422 = vpow2.f32 %v1308_v0 }
 0xc25   :  { %1424 = vpow2.f32 %v1312_v1 }
 0xc28   :  { %v1421_v17 = vpop.eup %1420 }
 0xc29   :  { %777 = vrot.lane.b32.xlu2 %v1421_v17, %s1520_s24 }
 0xc2a   :  { %v1423_v34 = vpop.eup %1422 }
 0xc2b   :  { %v758_v35 = vadd.f32 1.0, %v1423_v34  ;;  %v1425_v36 = vpop.eup %1424 }
 0xc2c   :  { %v833_v37 = vadd.f32 1.0, %v1425_v36 }
 0xc2d   :  { %1426 = vrcp.f32 %v758_v35  ;;  %v770_v11 = vand.u32 2147483648, %v758_v35  ;;  %vm764_vm13 = vweird.f32 %v758_v35  ;;  %v768_v18 = vand.u32 2147483647, %v758_v35 }
 0xc2e   :  { %1428 = vrcp.f32 %v833_v37  ;;  %v845_v25 = vand.u32 2147483648, %v833_v37  ;;  %vm839_vm5 = vweird.f32 %v833_v37  ;;  %v843_v27 = vand.u32 2147483647, %v833_v37 }
 0xc2f   :  { %v771_v21 = vor.u32 1.1754944e-38, %v770_v11  ;;  %vm769_vm15 = vcmp.eq.f32.partialorder %v768_v18, 8.507059e+37 }
 0xc30   :  { %v846_v29 = vor.u32 1.1754944e-38, %v845_v25  ;;  %vm844_vm7 = vcmp.eq.f32.partialorder %v843_v27, 8.507059e+37 }
 0xc33   :  { %v1427_v38 = vpop.eup %1426 }
 0xc34   :  { %v760_v39 = vmul.f32 %v1427_v38, %v758_v35  ;;  %v1429_v40 = vpop.eup %1428  ;;  %vm765_vm12 = vweird.f32 %v1427_v38 }
 0xc35   :  { %v835_v2 = vmul.f32 %v1429_v40, %v833_v37  ;;  %vm766_vm14 = vmor %vm764_vm13, %vm765_vm12  ;;  %vm840_vm4 = vweird.f32 %v1429_v40 }
 0xc36   :  { %v761_v43 = vsub.f32 1.0, %v760_v39  ;;  %vm841_vm6 = vmor %vm839_vm5, %vm840_vm4 }
 0xc37   :  { %v836_v7 = vsub.f32 1.0, %v835_v2 }
 0xc38   :  { %v762_v5 = vmul.f32 %v1427_v38, %v761_v43 }
 0xc39   :  { %v837_v19 = vmul.f32 %v1429_v40, %v836_v7 }
 0xc3a   :  { %v763_v9 = vadd.f32 %v1427_v38, %v762_v5 }
 0xc3b   :  { %v838_v22 = vadd.f32 %v1429_v40, %v837_v19 }
 0xc3c   :  { %v767_v20 = vsel %vm766_vm14, %v1427_v38, %v763_v9 }
 0xc3d   :  { %v772_v24 = vsel %vm769_vm15, %v771_v21, %v767_v20  ;;  %v842_v28 = vsel %vm841_vm6, %v1429_v40, %v838_v22 }
 0xc3e   :  { %v847_v31 = vsel %vm844_vm7, %v846_v29, %v842_v28  ;;  %v775_v48 = vmul.f32 %v772_v24, %v1886_v51 }
 0xc3f   :  { %v850_v41 = vmul.f32 %v847_v31, %v1890_v55 }
 0xc83   :  { %v778_v23 = vpop.permute.xlu2 %777 }
 0xc84   :  { %v780_v26 = vmul.f32 %v778_v23, %v772_v24 }
 0xc86   :  { %782 = vrot.lane.b32.xlu1 %v780_v26, %s1521_s25 }
 0xc89   :  { %v853_v30 = vpop.permute.xlu0 %852 }
 0xc8a   :  { %v855_v33 = vmul.f32 %v853_v30, %v847_v31 }
 0xc8c   :  { %857 = vrot.lane.b32.xlu2 %v855_v33, %s1521_s25 }
 0xce6   :  { %v858_v44 = vpop.permute.xlu2 %857 }
 0xce7   :  { %v1922_v45 = vadd.f32 %v858_v44, %v850_v41 }
 0xce9   :  { %1430 = vtanh.f32 %v1922_v45 }
 0xcef   :  { %v1431_v46 = vpop.eup %1430 }
 0xcf0   :  { %863 = vrot.lane.b32.xlu1 %v1431_v46, %s1520_s24 }
 0xcf8   :  { %v783_v49 = vpop.permute.xlu1 %782 }
 0xcf9   :  { %v1927_v50 = vadd.f32 %v783_v49, %v775_v48 }
 0xcfb   :  { %1432 = vtanh.f32 %v1927_v50 }
 0xd01   :  { %v1433_v53 = vpop.eup %1432 }
 0xd02   :  { %788 = vrot.lane.b32.xlu0 %v1433_v53, %s1520_s24  ;;  %v1082_v53 = vld [vmem:[%s1081_s14] sm:$0x1] }
 0xd62   :  { %v864_v32 = vpop.permute.xlu1 %863 }
 0xd63   :  { %v866_v55 = vmul.f32 %v864_v32, %v847_v31 }
 0xd65   :  { %947 = vrot.lane.b32.xlu1 %v866_v55, %s1522_s20  ;;  %868 = vrot.lane.b32.xlu2 %v866_v55, %s1521_s25 }
 0xd74   :  { %v789_v51 = vpop.permute.xlu0 %788 }
 0xd75   :  { %v791_v56 = vmul.f32 %v789_v51, %v772_v24 }
 0xd77   :  { %872 = vrot.lane.b32.xlu0 %v791_v56, %s1520_s24 }
 0xdbf   :  { %v869_v47 = vpop.permute.xlu2 %868 }
 0xdd7   :  { %v948_v61 = vpop.permute.xlu1 %947 }
 0xdd8   :  { %v950_v62 = vsel %vm80_vm2, %v946_v60, %v948_v61 }
 0xdd9   :  { %1317 = vmatmul.msk.f32.vlgmr.msrb.gmra.mxu0 %vm85_vm3, %v950_v62 }
 0xde9   :  { %v873_v54 = vpop.permute.xlu0 %872 }
 0xdea   :  { %v875_v63 = vsel %vm150_vm8, %v869_v47, %v873_v54  ;;  %v1982_v54 = vld [vmem:[%s2025_s5] ss:$0 sm:$0xff] }
 0xdeb   :  { %1313 = vmatmul.msk.f32.vlgmr.msra.gmra.mxu3 %vm155_vm9, %v875_v63 }
 0xe56   :  { %v971_v3 = vpop.f32.mrf.mxu0 }
 0xe57   :  { %v972_v4 = vadd.f32 %v1913_v12, %v971_v3 }
 0xe59   :  { %1434 = vtanh.f32 %v972_v4  ;;  %v1318_v13 = vmul.f32 -1.442695, %v972_v4 }
 0xe5f   :  { %v1435_v58 = vpop.eup %1434 }
 0xe60   :  { %996 = vrot.lane.b32.xlu0 %v1435_v58, %s1520_s24 }
 0xe6e   :  { %v896_v6 = vpop.f32.mrf.mxu3 }
 0xe6f   :  { %v897_v8 = vadd.f32 %v1749_v52, %v896_v6 }
 0xe71   :  { %1436 = vtanh.f32 %v897_v8  ;;  %v1314_v14 = vmul.f32 -1.442695, %v897_v8 }
 0xe72   :  { %1438 = vpow2.f32 %v1318_v13 }
 0xe73   :  { %1440 = vpow2.f32 %v1314_v14 }
 0xe77   :  { %v1437_v10 = vpop.eup %1436 }
 0xe78   :  { %921 = vrot.lane.b32.xlu2 %v1437_v10, %s1520_s24  ;;  %v1439_v15 = vpop.eup %1438 }
 0xe79   :  { %v1441_v16 = vpop.eup %1440  ;;  %v977_v17 = vadd.f32 1.0, %v1439_v15 }
 0xe7a   :  { %v902_v0 = vadd.f32 1.0, %v1441_v16 }
 0xe7b   :  { %1442 = vrcp.f32 %v977_v17  ;;  %vm983_vm12 = vweird.f32 %v977_v17  ;;  %v989_v5 = vand.u32 2147483648, %v977_v17  ;;  %v987_v9 = vand.u32 2147483647, %v977_v17 }
 0xe7c   :  { %1444 = vrcp.f32 %v902_v0  ;;  %v914_v2 = vand.u32 2147483648, %v902_v0  ;;  %vm908_vm13 = vweird.f32 %v902_v0  ;;  %v912_v7 = vand.u32 2147483647, %v902_v0 }
 0xe7d   :  { %v990_v20 = vor.u32 1.1754944e-38, %v989_v5  ;;  %vm988_vm5 = vcmp.eq.f32.partialorder %v987_v9, 8.507059e+37 }
 0xe7e   :  { %v915_v19 = vor.u32 1.1754944e-38, %v914_v2  ;;  %vm913_vm4 = vcmp.eq.f32.partialorder %v912_v7, 8.507059e+37 }
 0xe81   :  { %v1443_v1 = vpop.eup %1442 }
 0xe82   :  { %v1445_v34 = vpop.eup %1444  ;;  %v979_v36 = vmul.f32 %v1443_v1, %v977_v17  ;;  %vm984_vm10 = vweird.f32 %v1443_v1 }
 0xe83   :  { %v904_v35 = vmul.f32 %v1445_v34, %v902_v0  ;;  %vm909_vm11 = vweird.f32 %v1445_v34  ;;  %vm985_vm14 = vmor %vm983_vm12, %vm984_vm10 }
 0xe84   :  { %v980_v52 = vsub.f32 1.0, %v979_v36  ;;  %vm910_vm15 = vmor %vm908_vm13, %vm909_vm11 }
 0xe85   :  { %v905_v37 = vsub.f32 1.0, %v904_v35 }
 0xe86   :  { %v981_v39 = vmul.f32 %v1443_v1, %v980_v52 }
 0xe87   :  { %v906_v38 = vmul.f32 %v1445_v34, %v905_v37 }
 0xe88   :  { %v982_v43 = vadd.f32 %v1443_v1, %v981_v39 }
 0xe89   :  { %v907_v40 = vadd.f32 %v1445_v34, %v906_v38 }
 0xe8a   :  { %v986_v18 = vsel %vm985_vm14, %v1443_v1, %v982_v43 }
 0xe8b   :  { %v911_v11 = vsel %vm910_vm15, %v1445_v34, %v907_v40  ;;  %v991_v23 = vsel %vm988_vm5, %v990_v20, %v986_v18  ;;  %vm1257_vm15 = vcmask 31744  }
 0xe8c   :  { %v916_v22 = vsel %vm913_vm4, %v915_v19, %v911_v11  ;;  %v994_v27 = vmul.f32 %v991_v23, %v1922_v45 }
 0xe8d   :  { %v919_v31 = vmul.f32 %v916_v22, %v1927_v50  ;;  %v1344_v50 = vld [vmem:[%s1084_s10] ss:$0 sm:$0xff] }
 0xe8e   :  { %v1089_v32 = vsel %vm76_vm0, %v1082_v53, %v1344_v50 }
 0xe8f   :  { %v1090_v55 = vsel %vm78_vm1, %v1089_v32, 0.0 }
 0xed2   :  { %v922_v21 = vpop.permute.xlu2 %921  ;;  %v997_v24 = vpop.permute.xlu0 %996 }
 0xed3   :  { %v924_v25 = vmul.f32 %v922_v21, %v916_v22  ;;  %v999_v26 = vmul.f32 %v997_v24, %v991_v23 }
 0xed5   :  { %926 = vrot.lane.b32.xlu1 %v924_v25, %s1521_s25  ;;  %1001 = vrot.lane.b32.xlu2 %v999_v26, %s1521_s25 }
 0xf2f   :  { %v1002_v28 = vpop.permute.xlu2 %1001 }
 0xf30   :  { %v1953_v29 = vadd.f32 %v1002_v28, %v994_v27 }
 0xf32   :  { %1446 = vtanh.f32 %v1953_v29 }
 0xf38   :  { %v1447_v30 = vpop.eup %1446 }
 0xf39   :  { %1007 = vrot.lane.b32.xlu1 %v1447_v30, %s1520_s24 }
 0xf47   :  { %v927_v33 = vpop.permute.xlu1 %926 }
 0xf48   :  { %v1958_v41 = vadd.f32 %v927_v33, %v919_v31 }
 0xf4a   :  { %1448 = vtanh.f32 %v1958_v41 }
 0xf50   :  { %v1449_v44 = vpop.eup %1448 }
 0xf51   :  { %932 = vrot.lane.b32.xlu0 %v1449_v44, %s1520_s24 }
 0xfab   :  { %v1008_v45 = vpop.permute.xlu1 %1007 }
 0xfac   :  { %v1010_v46 = vmul.f32 %v1008_v45, %v991_v23 }
 0xfae   :  { %1091 = vrot.lane.b32.xlu1 %v1010_v46, %s1522_s20  ;;  %1012 = vrot.lane.b32.xlu2 %v1010_v46, %s1521_s25 }
 0xfc3   :  { %v933_v48 = vpop.permute.xlu0 %932 }
 0xfc4   :  { %v935_v49 = vmul.f32 %v933_v48, %v916_v22 }
 0xfc6   :  { %1016 = vrot.lane.b32.xlu0 %v935_v49, %s1520_s24 }
0x1008   :  { %v1013_v57 = vpop.permute.xlu2 %1012 }
0x1020   :  { %v1092_v51 = vpop.permute.xlu1 %1091 }
0x1021   :  { %v1094_v56 = vsel %vm80_vm2, %v1090_v55, %v1092_v51 }
0x1022   :  { %1323 = vmatmul.msk.f32.vlgmr.msrb.gmra.mxu1 %vm85_vm3, %v1094_v56 }
0x1038   :  { %v1017_v59 = vpop.permute.xlu0 %1016 }
0x1039   :  { %v1019_v42 = vsel %vm150_vm8, %v1013_v57, %v1017_v59 }
0x103a   :  { %1319 = vmatmul.msk.f32.vlgmr.msrb.gmra.mxu2 %vm155_vm9, %v1019_v42 }
0x109f   :  { %v1115_v60 = vpop.f32.mrf.mxu1 }
0x10a0   :  { %v1116_v61 = vadd.f32 %v1913_v12, %v1115_v60 }
0x10a2   :  { %1450 = vtanh.f32 %v1116_v61  ;;  %v1324_v4 = vmul.f32 -1.442695, %v1116_v61 }
0x10a8   :  { %v1451_v62 = vpop.eup %1450 }
0x10a9   :  { %1140 = vrot.lane.b32.xlu0 %v1451_v62, %s1520_s24 }
0x10bd   :  { %v1040_v47 = vpop.f32.mrf.mxu2 }
0x10be   :  { %v1041_v63 = vadd.f32 %v1982_v54, %v1040_v47 }
0x10c0   :  { %1452 = vtanh.f32 %v1041_v63  ;;  %v1320_v58 = vmul.f32 -1.442695, %v1041_v63 }
0x10c1   :  { %1454 = vpow2.f32 %v1324_v4 }
0x10c2   :  { %1456 = vpow2.f32 %v1320_v58 }
0x10c6   :  { %v1453_v3 = vpop.eup %1452 }
0x10c7   :  { %1065 = vrot.lane.b32.xlu2 %v1453_v3, %s1520_s24  ;;  %v1455_v12 = vpop.eup %1454 }
0x10c8   :  { %v1121_v6 = vadd.f32 1.0, %v1455_v12  ;;  %v1457_v8 = vpop.eup %1456 }
0x10c9   :  { %v1046_v10 = vadd.f32 1.0, %v1457_v8  ;;  %v1226_v8 = vld [vmem:[%s2026_s6 + $0x10] sm:$0xff] }
0x10ca   :  { %1458 = vrcp.f32 %v1121_v6  ;;  %v1133_v35 = vand.u32 2147483648, %v1121_v6  ;;  %vm1127_vm1 = vweird.f32 %v1121_v6  ;;  %v1131_v36 = vand.u32 2147483647, %v1121_v6 }
0x10cb   :  { %1460 = vrcp.f32 %v1046_v10  ;;  %v1058_v2 = vand.u32 2147483648, %v1046_v10  ;;  %vm1052_vm7 = vweird.f32 %v1046_v10  ;;  %v1056_v7 = vand.u32 2147483647, %v1046_v10 }
0x10cc   :  { %v1134_v38 = vor.u32 1.1754944e-38, %v1133_v35  ;;  %vm1132_vm3 = vcmp.eq.f32.partialorder %v1131_v36, 8.507059e+37 }
0x10cd   :  { %v1059_v11 = vor.u32 1.1754944e-38, %v1058_v2  ;;  %vm1057_vm11 = vcmp.eq.f32.partialorder %v1056_v7, 8.507059e+37 }
0x10d0   :  { %v1459_v13 = vpop.eup %1458 }
0x10d1   :  { %v1123_v14 = vmul.f32 %v1459_v13, %v1121_v6  ;;  %v1461_v15 = vpop.eup %1460  ;;  %vm1128_vm0 = vweird.f32 %v1459_v13  ;;  %v1227_v6 = vld [vmem:[%s2026_s6 + $0x18] sm:$0xff] }
0x10d2   :  { %v1048_v17 = vmul.f32 %v1461_v15, %v1046_v10  ;;  %vm1129_vm2 = vmor %vm1127_vm1, %vm1128_vm0  ;;  %vm1053_vm6 = vweird.f32 %v1461_v15  ;;  %1249 = vmatpush.msrb.mxu3 %v1227_v6  ;;  %v1225_v10 = vld [vmem:[%s2026_s6 + $0x8] sm:$0xff] }
0x10d3   :  { %v1124_v16 = vsub.f32 1.0, %v1123_v14  ;;  %vm1054_vm10 = vmor %vm1052_vm7, %vm1053_vm6 }
0x10d4   :  { %v1049_v1 = vsub.f32 1.0, %v1048_v17  ;;  %1250 = vmatpush.msrb.mxu3 %v1226_v8  ;;  %v1345_v17 = vld [vmem:[%s2027_s7] ss:$0 sm:$0xff] }
0x10d5   :  { %v1125_v0 = vmul.f32 %v1459_v13, %v1124_v16 }
0x10d6   :  { %v1050_v37 = vmul.f32 %v1461_v15, %v1049_v1  ;;  %1251 = vmatpush.msrb.mxu3 %v1225_v10 }
0x10d7   :  { %v1126_v34 = vadd.f32 %v1459_v13, %v1125_v0 }
0x10d8   :  { %v1051_v39 = vadd.f32 %v1461_v15, %v1050_v37 }
0x10d9   :  { %v1130_v52 = vsel %vm1129_vm2, %v1459_v13, %v1126_v34  ;;  %v1224_v13 = vld [vmem:[%s2026_s6] sm:$0xff] }
0x10da   :  { %v1135_v40 = vsel %vm1132_vm3, %v1134_v38, %v1130_v52  ;;  %v1055_v9 = vsel %vm1054_vm10, %v1461_v15, %v1051_v39  ;;  %1252 = vmatpush.msrb.mxu3 %v1224_v13 }
0x10db   :  { %v1060_v19 = vsel %vm1057_vm11, %v1059_v11, %v1055_v9  ;;  %v1138_v21 = vmul.f32 %v1135_v40, %v1953_v29 }
0x10dc   :  { %v1063_v25 = vmul.f32 %v1060_v19, %v1958_v41 }
0x111b   :  { %v1141_v43 = vpop.permute.xlu0 %1140 }
0x111c   :  { %v1143_v5 = vmul.f32 %v1141_v43, %v1135_v40 }
0x111e   :  { %1145 = vrot.lane.b32.xlu2 %v1143_v5, %s1521_s25 }
0x1121   :  { %v1066_v18 = vpop.permute.xlu2 %1065 }
0x1122   :  { %v1068_v20 = vmul.f32 %v1066_v18, %v1060_v19 }
0x1124   :  { %1070 = vrot.lane.b32.xlu1 %v1068_v20, %s1521_s25 }
0x1178   :  { %v1146_v22 = vpop.permute.xlu2 %1145 }
0x1179   :  { %v1148_v23 = vadd.f32 %v1146_v22, %v1138_v21 }
0x117b   :  { %1462 = vtanh.f32 %v1148_v23 }
0x1181   :  { %v1463_v24 = vpop.eup %1462 }
0x1182   :  { %1151 = vrot.lane.b32.xlu1 %v1463_v24, %s1520_s24 }
0x1196   :  { %v1071_v26 = vpop.permute.xlu1 %1070 }
0x1197   :  { %v1073_v27 = vadd.f32 %v1071_v26, %v1063_v25 }
0x1199   :  { %1464 = vtanh.f32 %v1073_v27 }
0x119f   :  { %v1465_v28 = vpop.eup %1464 }
0x11a0   :  { %1076 = vrot.lane.b32.xlu0 %v1465_v28, %s1520_s24 }
0x11f4   :  { %v1152_v30 = vpop.permute.xlu1 %1151 }
0x11f5   :  { %v1154_v31 = vmul.f32 %v1152_v30, %v1135_v40 }
0x11f7   :  { %1156 = vrot.lane.b32.xlu2 %v1154_v31, %s1521_s25 }
0x1212   :  { %v1077_v33 = vpop.permute.xlu0 %1076 }
0x1213   :  { %v1079_v29 = vmul.f32 %v1077_v33, %v1060_v19 }
0x1215   :  { %1160 = vrot.lane.b32.xlu0 %v1079_v29, %s1520_s24 }
0x1251   :  { %v1157_v44 = vpop.permute.xlu2 %1156 }
0x1287   :  { %v1161_v45 = vpop.permute.xlu0 %1160 }
0x1288   :  { %v1163_v46 = vsel %vm150_vm8, %v1157_v44, %v1161_v45 }
0x1289   :  { %1325 = vmatmul.msk.f32.vlgmr.msra.gmra.mxu0 %vm155_vm9, %v1163_v46 }
0x1306   :  { %v1184_v41 = vpop.f32.mrf.mxu0 }
0x1307   :  { %v1185_v48 = vadd.f32 %v1982_v54, %v1184_v41 }
0x1309   :  { %1466 = vtanh.f32 %v1185_v48  ;;  %v1326_v50 = vmul.f32 -1.442695, %v1185_v48 }
0x130b   :  { %1468 = vpow2.f32 %v1326_v50 }
0x130f   :  { %v1467_v49 = vpop.eup %1466 }
0x1310   :  { %1209 = vrot.lane.b32.xlu1 %v1467_v49, %s1520_s24 }
0x1311   :  { %v1469_v53 = vpop.eup %1468 }
0x1312   :  { %v1190_v32 = vadd.f32 1.0, %v1469_v53 }
0x1314   :  { %1470 = vrcp.f32 %v1190_v32  ;;  %v1202_v42 = vand.u32 2147483648, %v1190_v32  ;;  %vm1196_vm9 = vweird.f32 %v1190_v32  ;;  %v1200_v60 = vand.u32 2147483647, %v1190_v32 }
0x1316   :  { %v1203_v62 = vor.u32 1.1754944e-38, %v1202_v42  ;;  %vm1201_vm14 = vcmp.eq.f32.partialorder %v1200_v60, 8.507059e+37 }
0x131a   :  { %v1471_v55 = vpop.eup %1470 }
0x131b   :  { %v1192_v51 = vmul.f32 %v1471_v55, %v1190_v32  ;;  %vm1197_vm12 = vweird.f32 %v1471_v55 }
0x131c   :  { %vm1198_vm13 = vmor %vm1196_vm9, %vm1197_vm12 }
0x131d   :  { %v1193_v56 = vsub.f32 1.0, %v1192_v51 }
0x131f   :  { %v1194_v57 = vmul.f32 %v1471_v55, %v1193_v56 }
0x1321   :  { %v1195_v59 = vadd.f32 %v1471_v55, %v1194_v57 }
0x1323   :  { %v1199_v61 = vsel %vm1198_vm13, %v1471_v55, %v1195_v59 }
0x1324   :  { %v1204_v54 = vsel %vm1201_vm14, %v1203_v62, %v1199_v61 }
0x1325   :  { %v1207_v3 = vmul.f32 %v1204_v54, %v1073_v27 }
0x1382   :  { %v1210_v47 = vpop.permute.xlu1 %1209 }
0x1383   :  { %v1212_v63 = vmul.f32 %v1210_v47, %v1204_v54 }
0x1385   :  { %1214 = vrot.lane.b32.xlu2 %v1212_v63, %s1521_s25 }
0x13df   :  { %v1215_v4 = vpop.permute.xlu2 %1214 }
0x13e0   :  { %v1217_v58 = vadd.f32 %v1215_v4, %v1207_v3 }
0x13e2   :  { %1472 = vtanh.f32 %v1217_v58 }
0x13e8   :  { %v1473_v12 = vpop.eup %1472 }
0x13e9   :  { %1220 = vrot.lane.b32.xlu0 %v1473_v12, %s1520_s24 }
0x145b   :  { %v1221_v14 = vpop.permute.xlu0 %1220 }
0x145c   :  { %v1223_v15 = vmul.f32 %v1221_v14, %v1204_v54 }
0x145e   :  { %1233 = vrot.lane.b32.xlu1 %v1223_v15, %s1521_s25 }
0x14d0   :  { %v1234_v16 = vpop.permute.xlu1 %1233 }
0x14d1   :  { %1327 = vmatmul.msk.f32.vlgmr.msrb.gmra.mxu3 %vm150_vm8, %v1234_v16 }
0x1554   :  { %v1254_v0 = vpop.f32.mrf.mxu3 }
0x1555   :  { %v1255_v1 = vadd.f32 %v1345_v17, %v1254_v0 }
0x1557   :  { %1258 = vst.msk [vmem:[%s2028_s8] sm:$0xff] %vm1257_vm15, %v1255_v1 }
0x1558   :  { %1263 = vsyncpa [#allocation5], 1 }

</bundles_post_ra>
